<compile_context>
chip_gen: v6e
topology: v6e:2x2x1
jax: 0.10.0
libtpu: 0.0.40
codegen_flags: <defaults>
</compile_context>

<pallas_src>
import functools

import jax
import jax.numpy as jnp
from jax import lax
from jax.experimental import pallas as pl
from jax.experimental.pallas import tpu as pltpu


def _round_up(x, m):
    return ((x + m - 1) // m) * m


def _conv3x3_lrelu_kernel(a_ref, h_ref, w_ref, b_ref, o_ref, *, negative_slope):
    """One (batch, row-tile) grid step.

    a_ref : (1, tile_h, Wp, Cin)   main rows of the padded NHWC input
    h_ref : (1, 2, Wp, Cin)        2-row bottom halo (same array, 2-row blocks)
    w_ref : (3, 3, Cin, Cout)      weights
    b_ref : (1, Cout)              bias (f32)
    o_ref : (1, tile_h, W, Cout)   output tile (exactly Cout channels, no pad)
    """
    _, tile_h, wp, cin = a_ref.shape
    cout = w_ref.shape[-1]
    w_out = wp - 2
    m = tile_h * w_out

    # (tile_h + 2, Wp, Cin) slab = main rows + bottom halo (major-axis concat).
    slab = jnp.concatenate([a_ref[0], h_ref[0]], axis=0)

    # Hoisted kw compaction: 3 full-height, W-wide column slabs.  These are the
    # only relayout copies per step; the kh taps below are major-dim views.
    col = [slab[:, kw:kw + w_out, :] for kw in range(3)]

    # Local accumulator initialized with the broadcast bias (no VMEM scratch).
    # Chaining the 9 dots through a local value lets partial sums live in
    # vregs / the v7x MRB instead of round-tripping VMEM.
    acc = jnp.broadcast_to(b_ref[...].astype(jnp.float32), (m, cout))
    for kh in range(3):
        for kw in range(3):
            tap = col[kw][kh:kh + tile_h].reshape(m, cin)
            acc = acc + jnp.dot(tap, w_ref[kh, kw],
                                preferred_element_type=jnp.float32)

    out = jnp.maximum(acc, negative_slope * acc)          # leaky_relu, slope in [0,1]
    o_ref[...] = out.reshape(1, tile_h, w_out, cout).astype(o_ref.dtype)


def conv_leaky_relu2d(x_nchw, weight, bias, *, negative_slope=0.2,
                      tile_h=None, compute_dtype=None):
    """Forward of ConvLeakyRelu2d (kernel=3, stride=1, pad=1, dilation=1, groups=1).

    x_nchw : (N, Cin, H, W)   weight : (Cout, Cin, 3, 3)   bias : (Cout,)
    returns  (N, Cout, H, W)
    """
    N, Cin, H, W = x_nchw.shape
    Cout, Cin_w, KH, KW = weight.shape
    assert (KH, KW) == (3, 3) and Cin_w == Cin, "kernel specialized to 3x3 conv"
    assert 0.0 <= negative_slope <= 1.0, "max(x, a*x) form needs slope in [0, 1]"
    pad = 1

    dtype = jnp.dtype(compute_dtype) if compute_dtype is not None else x_nchw.dtype
    itemsize = jnp.dtype(dtype).itemsize
    Wp = W + 2 * pad

    # ---- tile_h sizing with lane/sublane-PADDED VMEM footprints ------------
    try:
        vmem_cap = int(pltpu.get_tpu_info().vmem_capacity_bytes)
    except Exception:
        vmem_cap = 64 * 1024 * 1024          # conservative (v7x-sized) fallback
    # Working-set budget: larger tiles on 128 MiB parts (v5e/v6e), conservative
    # on 64 MiB parts (v7x) so double buffering + compiler scratch always fit.
    budget = min(24 * 1024 * 1024, vmem_cap // 4)
    vmem_limit = min(vmem_cap * 3 // 4, 64 * 1024 * 1024)

    sub = max(8, 32 // itemsize)             # sublane granularity (8 f32 / 16 bf16)
    cin_l = _round_up(Cin, 128)              # lane-padded channel widths
    cout_l = _round_up(Cout, 128)
    wp_s = _round_up(Wp, sub)
    w_s = _round_up(W, sub)

    if tile_h is None:
        per_row = (2 * wp_s * cin_l * itemsize       # main input block, dbl-buffered
                   + 2 * w_s * cout_l * itemsize     # output block, dbl-buffered
                   + 3 * w_s * cin_l * itemsize      # hoisted kw column slabs (temps)
                   + w_s * cout_l * 4)               # f32 local accumulator
        fixed = (2 * 2 * wp_s * cin_l * itemsize                          # halo blocks
                 + 2 * 9 * _round_up(Cin, sub) * cout_l * itemsize        # weights
                 + 2 * cout_l * 4)                                        # bias
        tile_h = max(2, min(H, (budget - fixed) // max(per_row, 1)))
    tile_h = max(2, 2 * (tile_h // 2))                       # even (2-row halo blocks)
    tile_h = min(tile_h, max(2, _round_up(H, 2)))
    if N == 1 and tile_h >= H and H >= 4:
        # Keep the row-tile grid axis > 1 so both v7x TensorCores get work.
        tile_h = max(2, _round_up((H + 1) // 2, 2))
    half = tile_h // 2

    R = pl.cdiv(H, tile_h)                   # number of row tiles
    Hp_tot = R * tile_h + 2                  # conv pad + tile-alignment pad

    # Glue (one fused XLA pass): NCHW -> padded NHWC so Cin sits on lanes.
    x_nhwc = jnp.transpose(x_nchw, (0, 2, 3, 1)).astype(dtype)
    x_pad = jnp.pad(x_nhwc, ((0, 0), (pad, Hp_tot - pad - H), (pad, pad), (0, 0)))

    # Weights -> (KH, KW, Cin, Cout); bias -> f32 (1, Cout).  No Cout padding.
    w = jnp.transpose(weight, (2, 3, 1, 0)).astype(dtype)
    b = bias.astype(jnp.float32).reshape(1, Cout)

    out_nhwc = pl.pallas_call(
        functools.partial(_conv3x3_lrelu_kernel, negative_slope=negative_slope),
        out_shape=jax.ShapeDtypeStruct((N, R * tile_h, W, Cout), dtype),
        grid=(N, R),
        in_specs=[
            # main row slab of the padded input
            pl.BlockSpec((1, tile_h, Wp, Cin), lambda n, r: (n, r, 0, 0)),
            # 2-row bottom halo (same array, 2-row blocks)
            pl.BlockSpec((1, 2, Wp, Cin), lambda n, r: (n, (r + 1) * half, 0, 0)),
            # weights / bias: whole array, constant block (fetched once)
            pl.BlockSpec((3, 3, Cin, Cout), lambda n, r: (0, 0, 0, 0)),
            pl.BlockSpec((1, Cout), lambda n, r: (0, 0)),
        ],
        out_specs=pl.BlockSpec((1, tile_h, W, Cout), lambda n, r: (n, r, 0, 0)),
        compiler_params=pltpu.CompilerParams(
            dimension_semantics=("parallel", "parallel"),
            vmem_limit_bytes=int(vmem_limit),
        ),
    )(x_pad, x_pad, w, b)

    # Drop row padding only if the last tile overhangs H (no channel padding
    # exists anymore).  Back to NCHW to match the PyTorch interface.
    # TODO(synk): if the surrounding model can stay NHWC, drop this transpose
    # (it is an extra HBM pass over the output).
    out = out_nhwc if R * tile_h == H else out_nhwc[:, :H]
    return jnp.transpose(out, (0, 3, 1, 2)).astype(x_nchw.dtype)


if __name__ == "__main__":
    # Small, module-consistent shapes: batch=2, in_channels=4, out_channels=8,
    # spatial=16x16, kernel=3, padding=1, stride=1.
    N, Cin, Cout, H, W, K = 2, 4, 8, 16, 16, 3

    key = jax.random.PRNGKey(0)
    kx, kw, kb = jax.random.split(key, 3)
    x = jax.random.normal(kx, (N, Cin, H, W), dtype=jnp.float32)
    weight = jax.random.normal(kw, (Cout, Cin, K, K), dtype=jnp.float32) * 0.1
    bias = jax.random.normal(kb, (Cout,), dtype=jnp.float32) * 0.1

    out = conv_leaky_relu2d(x, weight, bias)
    out = jax.block_until_ready(out)

    # Reference: XLA conv + bias + leaky_relu(0.2).
    ref = lax.conv_general_dilated(
        x, weight, window_strides=(1, 1), padding=((1, 1), (1, 1)),
        dimension_numbers=("NCHW", "OIHW", "NCHW"))
    ref = ref + bias.reshape(1, Cout, 1, 1)
    ref = jnp.where(ref >= 0, ref, 0.2 * ref)

    assert out.shape == (N, Cout, H, W)
    assert jnp.allclose(out, ref, atol=1e-4, rtol=1e-4), float(
        jnp.max(jnp.abs(out - ref)))
    print("KERNEL_OK")
</pallas_src>

<mosaic_0001>
module attributes {stable_mosaic.version = 11 : i64} {
  func.func @_conv3x3_lrelu_kernel(%arg0: i32, %arg1: i32, %arg2: memref<1x16x18x4xf32, #tpu.memory_space<vmem>>, %arg3: memref<1x2x18x4xf32, #tpu.memory_space<vmem>>, %arg4: memref<3x3x4x8xf32, #tpu.memory_space<vmem>>, %arg5: memref<1x8xf32, #tpu.memory_space<vmem>>, %arg6: memref<1x16x16x8xf32, #tpu.memory_space<vmem>>) attributes {dimension_semantics = [#tpu.dimension_semantics<parallel>, #tpu.dimension_semantics<parallel>], iteration_bounds = array<i64: 2, 1>, scalar_prefetch = 0 : i64, scratch_operands = 0 : i64, tpu.core_type = #tpu.core_type<tc>, window_params = [{transform_indices = @transform_0, window_bounds = array<i64: 1, 16, 18, 4>}, {transform_indices = @transform_1, window_bounds = array<i64: 1, 2, 18, 4>}, {pipeline_mode = #tpu.pipeline_mode<synchronous>, transform_indices = @transform_2, window_bounds = array<i64: 3, 3, 4, 8>}, {pipeline_mode = #tpu.pipeline_mode<synchronous>, transform_indices = @transform_3, window_bounds = array<i64: 1, 8>}, {transform_indices = @transform_4, window_bounds = array<i64: 1, 16, 16, 8>}]} {
    %c0 = arith.constant 0 : index
    %c0_0 = arith.constant 0 : index
    %c0_1 = arith.constant 0 : index
    %c0_2 = arith.constant 0 : index
    %0 = vector.load %arg2[%c0, %c0_0, %c0_1, %c0_2] : memref<1x16x18x4xf32, #tpu.memory_space<vmem>>, vector<1x16x18x4xf32>
    %1 = vector.shape_cast %0 : vector<1x16x18x4xf32> to vector<16x18x4xf32>
    %c0_3 = arith.constant 0 : index
    %c0_4 = arith.constant 0 : index
    %c0_5 = arith.constant 0 : index
    %c0_6 = arith.constant 0 : index
    %2 = vector.load %arg3[%c0_3, %c0_4, %c0_5, %c0_6] : memref<1x2x18x4xf32, #tpu.memory_space<vmem>>, vector<1x2x18x4xf32>
    %3 = vector.shape_cast %2 : vector<1x2x18x4xf32> to vector<2x18x4xf32>
    %4 = tpu.concatenate %1, %3 in 0 : vector<16x18x4xf32>, vector<2x18x4xf32> -> vector<18x18x4xf32>
    %5 = vector.extract_strided_slice %4 {offsets = [0, 0, 0], sizes = [18, 16, 4], strides = [1, 1, 1]} : vector<18x18x4xf32> to vector<18x16x4xf32>
    %6 = vector.extract_strided_slice %4 {offsets = [0, 1, 0], sizes = [18, 16, 4], strides = [1, 1, 1]} : vector<18x18x4xf32> to vector<18x16x4xf32>
    %7 = vector.extract_strided_slice %4 {offsets = [0, 2, 0], sizes = [18, 16, 4], strides = [1, 1, 1]} : vector<18x18x4xf32> to vector<18x16x4xf32>
    %c0_7 = arith.constant 0 : index
    %c0_8 = arith.constant 0 : index
    %8 = vector.load %arg5[%c0_7, %c0_8] : memref<1x8xf32, #tpu.memory_space<vmem>>, vector<1x8xf32>
    %9 = vector.shape_cast %8 : vector<1x8xf32> to vector<1x8xf32>
    %10 = vector.broadcast %9 : vector<1x8xf32> to vector<256x8xf32>
    %11 = vector.extract_strided_slice %5 {offsets = [0, 0, 0], sizes = [16, 16, 4], strides = [1, 1, 1]} : vector<18x16x4xf32> to vector<16x16x4xf32>
    %12 = vector.shape_cast %11 : vector<16x16x4xf32> to vector<256x4xf32>
    %c0_9 = arith.constant 0 : index
    %c0_10 = arith.constant 0 : index
    %c0_11 = arith.constant 0 : index
    %c0_12 = arith.constant 0 : index
    %13 = vector.load %arg4[%c0_9, %c0_10, %c0_11, %c0_12] : memref<3x3x4x8xf32, #tpu.memory_space<vmem>>, vector<1x1x4x8xf32>
    %14 = vector.shape_cast %13 : vector<1x1x4x8xf32> to vector<4x8xf32>
    %cst = arith.constant dense<0.000000e+00> : vector<256x8xf32>
    %15 = tpu.matmul %12, %14, %cst {dimension_numbers = #tpu.dot_dimension_numbers<[1], [0], [0], [1], [0, 0, 1, 1], [], []>} : vector<256x4xf32>, vector<4x8xf32>, vector<256x8xf32> -> vector<256x8xf32>
    %16 = arith.addf %10, %15 : vector<256x8xf32>
    %17 = vector.extract_strided_slice %6 {offsets = [0, 0, 0], sizes = [16, 16, 4], strides = [1, 1, 1]} : vector<18x16x4xf32> to vector<16x16x4xf32>
    %18 = vector.shape_cast %17 : vector<16x16x4xf32> to vector<256x4xf32>
    %c0_13 = arith.constant 0 : index
    %c1 = arith.constant 1 : index
    %c0_14 = arith.constant 0 : index
    %c0_15 = arith.constant 0 : index
    %19 = vector.load %arg4[%c0_13, %c1, %c0_14, %c0_15] : memref<3x3x4x8xf32, #tpu.memory_space<vmem>>, vector<1x1x4x8xf32>
    %20 = vector.shape_cast %19 : vector<1x1x4x8xf32> to vector<4x8xf32>
    %cst_16 = arith.constant dense<0.000000e+00> : vector<256x8xf32>
    %21 = tpu.matmul %18, %20, %cst_16 {dimension_numbers = #tpu.dot_dimension_numbers<[1], [0], [0], [1], [0, 0, 1, 1], [], []>} : vector<256x4xf32>, vector<4x8xf32>, vector<256x8xf32> -> vector<256x8xf32>
    %22 = arith.addf %16, %21 : vector<256x8xf32>
    %23 = vector.extract_strided_slice %7 {offsets = [0, 0, 0], sizes = [16, 16, 4], strides = [1, 1, 1]} : vector<18x16x4xf32> to vector<16x16x4xf32>
    %24 = vector.shape_cast %23 : vector<16x16x4xf32> to vector<256x4xf32>
    %c0_17 = arith.constant 0 : index
    %c2 = arith.constant 2 : index
    %c0_18 = arith.constant 0 : index
    %c0_19 = arith.constant 0 : index
    %25 = vector.load %arg4[%c0_17, %c2, %c0_18, %c0_19] : memref<3x3x4x8xf32, #tpu.memory_space<vmem>>, vector<1x1x4x8xf32>
    %26 = vector.shape_cast %25 : vector<1x1x4x8xf32> to vector<4x8xf32>
    %cst_20 = arith.constant dense<0.000000e+00> : vector<256x8xf32>
    %27 = tpu.matmul %24, %26, %cst_20 {dimension_numbers = #tpu.dot_dimension_numbers<[1], [0], [0], [1], [0, 0, 1, 1], [], []>} : vector<256x4xf32>, vector<4x8xf32>, vector<256x8xf32> -> vector<256x8xf32>
    %28 = arith.addf %22, %27 : vector<256x8xf32>
    %29 = vector.extract_strided_slice %5 {offsets = [1, 0, 0], sizes = [16, 16, 4], strides = [1, 1, 1]} : vector<18x16x4xf32> to vector<16x16x4xf32>
    %30 = vector.shape_cast %29 : vector<16x16x4xf32> to vector<256x4xf32>
    %c1_21 = arith.constant 1 : index
    %c0_22 = arith.constant 0 : index
    %c0_23 = arith.constant 0 : index
    %c0_24 = arith.constant 0 : index
    %31 = vector.load %arg4[%c1_21, %c0_22, %c0_23, %c0_24] : memref<3x3x4x8xf32, #tpu.memory_space<vmem>>, vector<1x1x4x8xf32>
    %32 = vector.shape_cast %31 : vector<1x1x4x8xf32> to vector<4x8xf32>
    %cst_25 = arith.constant dense<0.000000e+00> : vector<256x8xf32>
    %33 = tpu.matmul %30, %32, %cst_25 {dimension_numbers = #tpu.dot_dimension_numbers<[1], [0], [0], [1], [0, 0, 1, 1], [], []>} : vector<256x4xf32>, vector<4x8xf32>, vector<256x8xf32> -> vector<256x8xf32>
    %34 = arith.addf %28, %33 : vector<256x8xf32>
    %35 = vector.extract_strided_slice %6 {offsets = [1, 0, 0], sizes = [16, 16, 4], strides = [1, 1, 1]} : vector<18x16x4xf32> to vector<16x16x4xf32>
    %36 = vector.shape_cast %35 : vector<16x16x4xf32> to vector<256x4xf32>
    %c1_26 = arith.constant 1 : index
    %c1_27 = arith.constant 1 : index
    %c0_28 = arith.constant 0 : index
    %c0_29 = arith.constant 0 : index
    %37 = vector.load %arg4[%c1_26, %c1_27, %c0_28, %c0_29] : memref<3x3x4x8xf32, #tpu.memory_space<vmem>>, vector<1x1x4x8xf32>
    %38 = vector.shape_cast %37 : vector<1x1x4x8xf32> to vector<4x8xf32>
    %cst_30 = arith.constant dense<0.000000e+00> : vector<256x8xf32>
    %39 = tpu.matmul %36, %38, %cst_30 {dimension_numbers = #tpu.dot_dimension_numbers<[1], [0], [0], [1], [0, 0, 1, 1], [], []>} : vector<256x4xf32>, vector<4x8xf32>, vector<256x8xf32> -> vector<256x8xf32>
    %40 = arith.addf %34, %39 : vector<256x8xf32>
    %41 = vector.extract_strided_slice %7 {offsets = [1, 0, 0], sizes = [16, 16, 4], strides = [1, 1, 1]} : vector<18x16x4xf32> to vector<16x16x4xf32>
    %42 = vector.shape_cast %41 : vector<16x16x4xf32> to vector<256x4xf32>
    %c1_31 = arith.constant 1 : index
    %c2_32 = arith.constant 2 : index
    %c0_33 = arith.constant 0 : index
    %c0_34 = arith.constant 0 : index
    %43 = vector.load %arg4[%c1_31, %c2_32, %c0_33, %c0_34] : memref<3x3x4x8xf32, #tpu.memory_space<vmem>>, vector<1x1x4x8xf32>
    %44 = vector.shape_cast %43 : vector<1x1x4x8xf32> to vector<4x8xf32>
    %cst_35 = arith.constant dense<0.000000e+00> : vector<256x8xf32>
    %45 = tpu.matmul %42, %44, %cst_35 {dimension_numbers = #tpu.dot_dimension_numbers<[1], [0], [0], [1], [0, 0, 1, 1], [], []>} : vector<256x4xf32>, vector<4x8xf32>, vector<256x8xf32> -> vector<256x8xf32>
    %46 = arith.addf %40, %45 : vector<256x8xf32>
    %47 = vector.extract_strided_slice %5 {offsets = [2, 0, 0], sizes = [16, 16, 4], strides = [1, 1, 1]} : vector<18x16x4xf32> to vector<16x16x4xf32>
    %48 = vector.shape_cast %47 : vector<16x16x4xf32> to vector<256x4xf32>
    %c2_36 = arith.constant 2 : index
    %c0_37 = arith.constant 0 : index
    %c0_38 = arith.constant 0 : index
    %c0_39 = arith.constant 0 : index
    %49 = vector.load %arg4[%c2_36, %c0_37, %c0_38, %c0_39] : memref<3x3x4x8xf32, #tpu.memory_space<vmem>>, vector<1x1x4x8xf32>
    %50 = vector.shape_cast %49 : vector<1x1x4x8xf32> to vector<4x8xf32>
    %cst_40 = arith.constant dense<0.000000e+00> : vector<256x8xf32>
    %51 = tpu.matmul %48, %50, %cst_40 {dimension_numbers = #tpu.dot_dimension_numbers<[1], [0], [0], [1], [0, 0, 1, 1], [], []>} : vector<256x4xf32>, vector<4x8xf32>, vector<256x8xf32> -> vector<256x8xf32>
    %52 = arith.addf %46, %51 : vector<256x8xf32>
    %53 = vector.extract_strided_slice %6 {offsets = [2, 0, 0], sizes = [16, 16, 4], strides = [1, 1, 1]} : vector<18x16x4xf32> to vector<16x16x4xf32>
    %54 = vector.shape_cast %53 : vector<16x16x4xf32> to vector<256x4xf32>
    %c2_41 = arith.constant 2 : index
    %c1_42 = arith.constant 1 : index
    %c0_43 = arith.constant 0 : index
    %c0_44 = arith.constant 0 : index
    %55 = vector.load %arg4[%c2_41, %c1_42, %c0_43, %c0_44] : memref<3x3x4x8xf32, #tpu.memory_space<vmem>>, vector<1x1x4x8xf32>
    %56 = vector.shape_cast %55 : vector<1x1x4x8xf32> to vector<4x8xf32>
    %cst_45 = arith.constant dense<0.000000e+00> : vector<256x8xf32>
    %57 = tpu.matmul %54, %56, %cst_45 {dimension_numbers = #tpu.dot_dimension_numbers<[1], [0], [0], [1], [0, 0, 1, 1], [], []>} : vector<256x4xf32>, vector<4x8xf32>, vector<256x8xf32> -> vector<256x8xf32>
    %58 = arith.addf %52, %57 : vector<256x8xf32>
    %59 = vector.extract_strided_slice %7 {offsets = [2, 0, 0], sizes = [16, 16, 4], strides = [1, 1, 1]} : vector<18x16x4xf32> to vector<16x16x4xf32>
    %60 = vector.shape_cast %59 : vector<16x16x4xf32> to vector<256x4xf32>
    %c2_46 = arith.constant 2 : index
    %c2_47 = arith.constant 2 : index
    %c0_48 = arith.constant 0 : index
    %c0_49 = arith.constant 0 : index
    %61 = vector.load %arg4[%c2_46, %c2_47, %c0_48, %c0_49] : memref<3x3x4x8xf32, #tpu.memory_space<vmem>>, vector<1x1x4x8xf32>
    %62 = vector.shape_cast %61 : vector<1x1x4x8xf32> to vector<4x8xf32>
    %cst_50 = arith.constant dense<0.000000e+00> : vector<256x8xf32>
    %63 = tpu.matmul %60, %62, %cst_50 {dimension_numbers = #tpu.dot_dimension_numbers<[1], [0], [0], [1], [0, 0, 1, 1], [], []>} : vector<256x4xf32>, vector<4x8xf32>, vector<256x8xf32> -> vector<256x8xf32>
    %64 = arith.addf %58, %63 : vector<256x8xf32>
    %cst_51 = arith.constant 2.000000e-01 : f32
    %65 = vector.broadcast %cst_51 : f32 to vector<256x8xf32>
    %66 = arith.mulf %65, %64 : vector<256x8xf32>
    %67 = arith.maximumf %64, %66 : vector<256x8xf32>
    %68 = vector.shape_cast %67 : vector<256x8xf32> to vector<1x16x16x8xf32>
    %c0_52 = arith.constant 0 : index
    %c0_53 = arith.constant 0 : index
    %c0_54 = arith.constant 0 : index
    %c0_55 = arith.constant 0 : index
    %69 = vector.load %arg6[%c0_52, %c0_53, %c0_54, %c0_55] : memref<1x16x16x8xf32, #tpu.memory_space<vmem>>, vector<1x16x16x8xf32>
    tpu.vector_store %arg6[%c0_52, %c0_53, %c0_54, %c0_55], %68 {strides = array<i32>} : memref<1x16x16x8xf32, #tpu.memory_space<vmem>>, vector<1x16x16x8xf32>,
    return
  }
  func.func @transform_0(%arg0: i32, %arg1: i32) -> (i32, i32, i32, i32) {
    %c0_i32 = arith.constant 0 : i32
    %c0_i32_0 = arith.constant 0 : i32
    %c0_i32_1 = arith.constant 0 : i32
    return %arg0, %arg1, %c0_i32, %c0_i32_0 : i32, i32, i32, i32
  }
  func.func @transform_1(%arg0: i32, %arg1: i32) -> (i32, i32, i32, i32) {
    %c1_i32 = arith.constant 1 : i32
    %0 = arith.addi %arg1, %c1_i32 : i32
    %c8_i32 = arith.constant 8 : i32
    %1 = arith.muli %0, %c8_i32 : i32
    %c0_i32 = arith.constant 0 : i32
    %c0_i32_0 = arith.constant 0 : i32
    %c0_i32_1 = arith.constant 0 : i32
    return %arg0, %1, %c0_i32, %c0_i32_0 : i32, i32, i32, i32
  }
  func.func @transform_2(%arg0: i32, %arg1: i32) -> (i32, i32, i32, i32) {
    %c0_i32 = arith.constant 0 : i32
    %c0_i32_0 = arith.constant 0 : i32
    %c0_i32_1 = arith.constant 0 : i32
    %c0_i32_2 = arith.constant 0 : i32
    %c0_i32_3 = arith.constant 0 : i32
    return %c0_i32, %c0_i32_0, %c0_i32_1, %c0_i32_2 : i32, i32, i32, i32
  }
  func.func @transform_3(%arg0: i32, %arg1: i32) -> (i32, i32) {
    %c0_i32 = arith.constant 0 : i32
    %c0_i32_0 = arith.constant 0 : i32
    %c0_i32_1 = arith.constant 0 : i32
    return %c0_i32, %c0_i32_0 : i32, i32
  }
  func.func @transform_4(%arg0: i32, %arg1: i32) -> (i32, i32, i32, i32) {
    %c0_i32 = arith.constant 0 : i32
    %c0_i32_0 = arith.constant 0 : i32
    %c0_i32_1 = arith.constant 0 : i32
    return %arg0, %arg1, %c0_i32, %c0_i32_0 : i32, i32, i32, i32
  }
}

</mosaic_0001>

<bundles_post_ra>
// kernel: tpu_custom_call.1
= control target key start
LH: loop header
LB: loop body
LE: loop exit
PB: predicated region body
PF: predicated region fallthrough
CT: control target
= control target key end

     0   :  { %s4551_s15 = smov 0   ;;  %s4553_s16 = smov 0   ;;  %s6217_s0 = inlined_call_operand.vmem [shape: f32[2,18,18,4], index: 0, kind: input, shape index: {}]   ;;  %s6218_s1 = inlined_call_operand.vmem [shape: f32[2,18,18,4], index: 1, kind: input, shape index: {}]   ;;  %s6219_s2 = inlined_call_operand.vmem [shape: f32[3,3,4,8], index: 2, kind: input, shape index: {}]   ;;  %s6220_s3 = inlined_call_operand.vmem [shape: f32[1,8], index: 3, kind: input, shape index: {}]   ;;  %s6221_s4 = inlined_call_operand.vmem [shape: f32[2,16,16,8], index: 4, kind: output, shape index: {}]  }
   0x1   :  { %s4555_s17 = smov 0  }
   0x2 LB: > { %s26_s18 = sadd.s32 1, %s4520_s16  ;;  %p3410_p0 = scmp.ge.s32.totalorder %s4524_s17, 1  ;;  %s4524_s17 = sphi %s4555_s17, %s14_s17   ;;  %s4520_s16 = sphi %s4553_s16, %s6546_s16   ;;  %s4516_s15 = sphi %s4551_s15, %s6545_s15  }
   0x3   : > { %p28_p1 = scmp.ge.s32.totalorder %s26_s18, 2  ;;  %p220_p2 = scmp.lt.s32.totalorder %s4524_s17, 3 }
   0x5   : > { %s6548_s18 = smov (%p28_p1, %s26_s18), 0  ;;  %p221_p3 = pnand %p3410_p0, %p220_p2 }
   0x7   : > { %224 = sbr.rel (%p221_p3) target bundleno = 509 (0x1fd), region = 36 }
   0xc   : > { %v381_v0 = vld [vmem:[%s6219_s2] sm:$0xf]  ;;  %vm479_vm0 = vcmask 1043456   ;;  %p279_p4 = scmp.lt.s32.totalorder %s4516_s15, 1  ;;  %v3449_v1 = vld [vmem:[%s6219_s2 + $0x4] sm:$0xf] }
   0xd   : > { %4473 = vmatprep.subr.msk.mxu1 %vm479_vm0, %v381_v0  ;;  %4023 = vmatprep.subr.msk.mxu0 %vm479_vm0, %v381_v0  ;;  %v3483_v2 = vld [vmem:[%s6219_s2 + $0x8] sm:$0xf]  ;;  %vm382_vm1 = vcmask 31744   ;;  %v4623_v9 = vld [vmem:[%s6219_s2 + $0xc] sm:$0xf]  ;;  %vm756_vm2 = vcmask 1046528  }
   0xe   : > { %4474 = vmatpush3.msk.msra.mxu1 %vm479_vm0, %v381_v0  ;;  %4024 = vmatpush3.msk.msra.mxu0 %vm479_vm0, %v381_v0  ;;  %s6550_s15 = smov (!%p279_p4, %s4516_s15), 1  ;;  %v4628_v10 = vld [vmem:[%s6219_s2 + $0x10] sm:$0xf]  ;;  %vm1163_vm3 = vcmask 1045504   ;;  %v4806_v0 = vld [vmem:[%s6219_s2 + $0x14] sm:$0xf] }
   0xf   : > { %4073 = vmatprep.subr.msk.mxu1 %vm479_vm0, %v3449_v1  ;;  %4123 = vmatprep.subr.msk.mxu0 %vm479_vm0, %v3483_v2  ;;  %s4475_s25 = smul.u32 432, %s6550_s15  ;;  %vm3256_vm4 = vcmask 64512  }
  0x11   : > { %s4592_s28 = scalar_lea.vmem %s6217_s0, %s4475_s25  ;;  %s3724_s19 = sadd.s32 384, %s4475_s25 }
  0x12   : > { %v4595_v3 = vld [vmem:[%s4592_s28] sm:$0xff]  ;;  %v4601_v5 = vld [vmem:[%s4592_s28 + $0x8] sm:$0xff]  ;;  %v4611_v7 = vld [vmem:[%s4592_s28 + $0x18] sm:$0xff]  ;;  %s5295_s22 = scalar_lea.vmem %s6218_s1, %s3724_s19  ;;  %s3725_s25 = sshll.u32 %s6550_s15, 8 }
  0x13   : > { %v4598_v4 = vld [vmem:[%s4592_s28 + $0xc0] sm:$0xff]  ;;  %4025 = vmatprep.mubr.msk.f32.mxu0 %vm382_vm1, %v4595_v3  ;;  %v4608_v6 = vld [vmem:[%s4592_s28 + $0xc8] sm:$0xff]  ;;  %v4618_v8 = vld [vmem:[%s4592_s28 + $0xd8] sm:$0xff]  ;;  %v757_v31 = vrot.slane %v4595_v3, 1  ;;  %v1164_v32 = vrot.slane %v4595_v3, 2  ;;  %v758_v35 = vrot.slane %v4601_v5, 1  ;;  %s6065_s15 = scalar_lea.vmem %s6221_s4, %s3725_s25 }
  0x14   : > { %4049 = vmatprep.mubr.msk.f32.mxu1 %vm382_vm1, %v4598_v4  ;;  %4026 = vmatmul.mubr.msk.f32.vlgmr.msra.gmra.mxu0 %vm382_vm1, %v4601_v5  ;;  %v4633_v11 = vld [vmem:[%s4592_s28 + $0x20] sm:$0xff]  ;;  %v4643_v13 = vld [vmem:[%s4592_s28 + $0x30] sm:$0xff]  ;;  %v4661_v15 = vld [vmem:[%s4592_s28 + $0x38] sm:$0xff]  ;;  %v1165_v36 = vrot.slane %v4601_v5, 2  ;;  %v762_v47 = vrot.slane %v4611_v7, 1  ;;  %v1169_v48 = vrot.slane %v4611_v7, 2 }
  0x15   : > { %4050 = vmatmul.mubr.msk.f32.vlgmr.msra.gmra.mxu1 %vm382_vm1, %v4608_v6  ;;  %4124 = vmatpush3.msk.msra.mxu0 %vm479_vm0, %v3483_v2  ;;  %v4636_v12 = vld [vmem:[%s4592_s28 + $0xe0] sm:$0xff]  ;;  %v4646_v14 = vld [vmem:[%s4592_s28 + $0xf0] sm:$0xff]  ;;  %v4664_v16 = vld [vmem:[%s4592_s28 + $0xf8] sm:$0xff]  ;;  %v759_v44 = vsel %vm756_vm2, %v757_v31, %v758_v35  ;;  %v763_v49 = vrot.slane %v4633_v11, 1  ;;  %v1170_v50 = vrot.slane %v4633_v11, 2  ;;  %v767_v51 = vrot.slane %v4643_v13, 1 }
  0x16   : > { %4074 = vmatpush3.msk.msra.mxu1 %vm479_vm0, %v3449_v1  ;;  %6315 = vst [vmem:[#allocation2_spill] sm:$0xff] %v4636_v12  ;;  %4028 = vmatprep.mubr.msk.f32.mxu0 %vm382_vm1, %v4611_v7  ;;  %6316 = vst [vmem:[#allocation3_spill] sm:$0xff] %v4664_v16  ;;  %v4667_v17 = vld [vmem:[%s4592_s28 + $0x48] sm:$0xff]  ;;  %v4681_v19 = vld [vmem:[%s4592_s28 + $0x50] sm:$0xff]  ;;  %v1166_v45 = vsel %vm1163_vm3, %v1164_v32, %v1165_v36  ;;  %v768_v52 = vrot.slane %v4661_v15, 1  ;;  %v1174_v57 = vrot.slane %v4643_v13, 2 }
  0x17   : > { %4052 = vmatprep.mubr.msk.f32.mxu1 %vm382_vm1, %v4618_v8  ;;  %4173 = vmatprep.subr.msk.mxu1 %vm479_vm0, %v4623_v9  ;;  %v4670_v18 = vld [vmem:[%s4592_s28 + $0x108] sm:$0xff]  ;;  %v4684_v20 = vld [vmem:[%s4592_s28 + $0x110] sm:$0xff]  ;;  %v4687_v21 = vld [vmem:[%s4592_s28 + $0x60] sm:$0xff]  ;;  %v1175_v58 = vrot.slane %v4661_v15, 2  ;;  %v4792_v60 = vsel %vm756_vm2, %v762_v47, %v763_v49  ;;  %v4795_v61 = vsel %vm1163_vm3, %v1169_v48, %v1170_v50  ;;  %v772_v63 = vrot.slane %v4667_v17, 1 }
  0x18   : > { %4223 = vmatprep.subr.msk.mxu0 %vm479_vm0, %v4628_v10  ;;  %4029 = vmatmul.mubr.msk.f32.gmra.mxu0 %vm382_vm1, %v4633_v11  ;;  %6317 = vst [vmem:[#allocation4_spill] sm:$0xff] %v4670_v18  ;;  %6318 = vst [vmem:[#allocation5_spill] sm:$0xff] %v4684_v20  ;;  %v4690_v22 = vld [vmem:[%s4592_s28 + $0x120] sm:$0xff]  ;;  %v4701_v23 = vld [vmem:[%s4592_s28 + $0x68] sm:$0xff]  ;;  %v4800_v62 = vsel %vm756_vm2, %v767_v51, %v768_v52 }
  0x19   : > { %4053 = vmatmul.mubr.msk.f32.gmra.mxu1 %vm382_vm1, %v4636_v12  ;;  %4031 = vmatprep.mubr.msk.f32.mxu0 %vm382_vm1, %v4643_v13  ;;  %v4704_v24 = vld [vmem:[%s4592_s28 + $0x128] sm:$0xff]  ;;  %v4707_v25 = vld [vmem:[%s4592_s28 + $0x78] sm:$0xff]  ;;  %v4721_v27 = vld [vmem:[%s4592_s28 + $0x80] sm:$0xff]  ;;  %6325 = vst [vmem:[#allocation12_spill] sm:$0xff] %v4795_v61  ;;  %v4828_v32 = vsel %vm1163_vm3, %v1174_v57, %v1175_v58 }
  0x1a   : > { %4055 = vmatprep.mubr.msk.f32.mxu1 %vm382_vm1, %v4646_v14  ;;  %6319 = vst [vmem:[#allocation6_spill] sm:$0xff] %v4704_v24  ;;  %v4710_v26 = vld [vmem:[%s4592_s28 + $0x138] sm:$0xff]  ;;  %v4724_v28 = vld [vmem:[%s4592_s28 + $0x140] sm:$0xff]  ;;  %v4727_v29 = vld [vmem:[%s4592_s28 + $0x90] sm:$0xff] }
  0x1b   : > { %6320 = vst [vmem:[#allocation7_spill] sm:$0xff] %v4710_v26  ;;  %6321 = vst [vmem:[#allocation8_spill] sm:$0xff] %v4724_v28  ;;  %v4730_v30 = vld [vmem:[%s4592_s28 + $0x150] sm:$0xff]  ;;  %v4743_v33 = vld [vmem:[%s4592_s28 + $0x98] sm:$0xff] }
  0x1c   : > { %4032 = vmatmul.mubr.msk.f32.gmra.mxu0 %vm382_vm1, %v4661_v15  ;;  %v4746_v34 = vld [vmem:[%s4592_s28 + $0x158] sm:$0xff]  ;;  %v4751_v37 = vld [vmem:[%s4592_s28 + $0xa8] sm:$0xff]  ;;  %v322_v39 = vld [vmem:[%s4592_s28 + $0x10] sm:$0x3]  ;;  %6327 = vst [vmem:[#allocation14_spill] sm:$0xff] %v4828_v32 }
  0x1d   : > { %4056 = vmatmul.mubr.msk.f32.gmra.mxu1 %vm382_vm1, %v4664_v16  ;;  %4034 = vmatprep.mubr.msk.f32.mxu0 %vm382_vm1, %v4667_v17  ;;  %6322 = vst [vmem:[#allocation9_spill] sm:$0xff] %v4746_v34  ;;  %v4754_v38 = vld [vmem:[%s4592_s28 + $0x168] sm:$0xff]  ;;  %v4766_v40 = vld [vmem:[%s4592_s28 + $0xb0] sm:$0xff]  ;;  %v760_v42 = vrot.slane %v322_v39, 1  ;;  %v1167_v43 = vrot.slane %v322_v39, 2  ;;  %v777_v39 = vrot.slane %v4687_v21, 1 }
  0x1e   : > { %4058 = vmatprep.mubr.msk.f32.mxu1 %vm382_vm1, %v4670_v18  ;;  %6323 = vst [vmem:[#allocation10_spill] sm:$0xff] %v4754_v38  ;;  %v4769_v41 = vld [vmem:[%s4592_s28 + $0x170] sm:$0xff]  ;;  %v325_v46 = vld [vmem:[%s4592_s28 + $0x28] sm:$0x3]  ;;  %v328_v59 = vld [vmem:[%s4592_s28 + $0x40] sm:$0x3] }
  0x1f   : > { %6324 = vst [vmem:[#allocation11_spill] sm:$0xff] %v4769_v41  ;;  %v761_v53 = vsel %vm756_vm2, %v758_v35, %v760_v42  ;;  %v1168_v54 = vsel %vm1163_vm3, %v1165_v36, %v1167_v43  ;;  %v765_v55 = vrot.slane %v325_v46, 1  ;;  %v1172_v56 = vrot.slane %v325_v46, 2  ;;  %v4811_v1 = vld [vmem:[%s6219_s2 + $0x18] sm:$0xf] }
  0x20   : > { %4035 = vmatmul.mubr.msk.f32.gmra.mxu0 %vm382_vm1, %v4681_v19  ;;  %v770_v5 = vrot.slane %v328_v59, 1  ;;  %v1177_v31 = vrot.slane %v328_v59, 2  ;;  %v1180_v35 = vrot.slane %v4681_v19, 2  ;;  %v331_v36 = vld [vmem:[%s4592_s28 + $0x58] sm:$0x3]  ;;  %v778_v42 = vrot.slane %v4701_v23, 1 }
  0x21   : > { %4059 = vmatmul.mubr.msk.f32.gmra.mxu1 %vm382_vm1, %v4684_v20  ;;  %4037 = vmatprep.mubr.msk.f32.mxu0 %vm382_vm1, %v4687_v21  ;;  %v4818_v2 = vsel %vm756_vm2, %v763_v49, %v765_v55  ;;  %v4821_v3 = vsel %vm1163_vm3, %v1170_v50, %v1172_v56  ;;  %v1182_v46 = vrot.slane %v331_v36, 2  ;;  %v1184_v49 = vrot.slane %v4687_v21, 2  ;;  %v334_v51 = vld [vmem:[%s4592_s28 + $0x70] sm:$0x3] }
  0x22   : > { %4061 = vmatprep.mubr.msk.f32.mxu1 %vm382_vm1, %v4690_v22  ;;  %6326 = vst [vmem:[#allocation13_spill] sm:$0xff] %v4821_v3  ;;  %v4849_v43 = vsel %vm756_vm2, %v768_v52, %v770_v5  ;;  %v1185_v50 = vrot.slane %v4701_v23, 2  ;;  %v4868_v52 = vsel %vm756_vm2, %v777_v39, %v778_v42  ;;  %v780_v56 = vrot.slane %v334_v51, 1 }
  0x23   : > { %v4879_v55 = vsel %vm1163_vm3, %v1180_v35, %v1182_v46  ;;  %v1187_v57 = vrot.slane %v334_v51, 2  ;;  %v1189_v5 = vrot.slane %v4707_v25, 2  ;;  %v1194_v51 = vrot.slane %v4727_v29, 2 }
  0x24   : > { %4038 = vmatmul.mubr.msk.f32.gmra.mxu0 %vm382_vm1, %v4701_v23  ;;  %6330 = vst [vmem:[#allocation17_spill] sm:$0xff] %v4879_v55  ;;  %v4883_v59 = vsel %vm1163_vm3, %v1184_v49, %v1185_v50 }
  0x25   : > { %4062 = vmatmul.mubr.msk.f32.gmra.mxu1 %vm382_vm1, %v4704_v24  ;;  %4040 = vmatprep.mubr.msk.f32.mxu0 %vm382_vm1, %v4707_v25  ;;  %6331 = vst [vmem:[#allocation18_spill] sm:$0xff] %v4883_v59  ;;  %v4902_v39 = vsel %vm1163_vm3, %v1185_v50, %v1187_v57 }
  0x26   : > { %4064 = vmatprep.mubr.msk.f32.mxu1 %vm382_vm1, %v4710_v26  ;;  %6332 = vst [vmem:[#allocation19_spill] sm:$0xff] %v4902_v39 }
  0x28   : > { %4041 = vmatmul.mubr.msk.f32.gmra.mxu0 %vm382_vm1, %v4721_v27 }
  0x29   : > { %4065 = vmatmul.mubr.msk.f32.gmra.mxu1 %vm382_vm1, %v4724_v28  ;;  %4043 = vmatprep.mubr.msk.f32.mxu0 %vm382_vm1, %v4727_v29 }
  0x2a   : > { %4067 = vmatprep.mubr.msk.f32.mxu1 %vm382_vm1, %v4730_v30 }
  0x2c   : > { %4044 = vmatmul.mubr.msk.f32.gmra.mxu0 %vm382_vm1, %v4743_v33 }
  0x2d   : > { %4068 = vmatmul.mubr.msk.f32.gmra.mxu1 %vm382_vm1, %v4746_v34  ;;  %4046 = vmatprep.mubr.msk.f32.mxu0 %vm382_vm1, %v4751_v37 }
  0x2e   : > { %4070 = vmatprep.mubr.msk.f32.mxu1 %vm382_vm1, %v4754_v38 }
  0x30   : > { %4047 = vmatmul.mubr.msk.f32.gmra.mxu0 %vm382_vm1, %v4766_v40 }
  0x31   : > { %4071 = vmatmul.mubr.msk.f32.gmra.mxu1 %vm382_vm1, %v4769_v41  ;;  %4125 = vmatprep.mubr.msk.f32.mxu0 %vm382_vm1, %v1166_v45  ;;  %v775_v45 = vrot.slane %v331_v36, 1  ;;  %v4899_v36 = vsel %vm756_vm2, %v778_v42, %v780_v56 }
  0x32   : > { %4075 = vmatprep.mubr.msk.f32.mxu1 %vm382_vm1, %v759_v44  ;;  %v4852_v44 = vsel %vm1163_vm3, %v1175_v58, %v1177_v31  ;;  %v337_v58 = vld [vmem:[%s4592_s28 + $0x88] sm:$0x3]  ;;  %v1190_v31 = vrot.slane %v4721_v27, 2 }
  0x33   : > { %6328 = vst [vmem:[#allocation15_spill] sm:$0xff] %v4852_v44 }
  0x34   : > { %4126 = vmatmul.mubr.msk.f32.vlgmr.msra.gmra.mxu0 %vm382_vm1, %v1168_v54  ;;  %v4908_v49 = vsel %vm1163_vm3, %v1189_v5, %v1190_v31  ;;  %v343_v5 = vld [vmem:[%s4592_s28 + $0xb8] sm:$0x3] }
  0x35   : > { %4076 = vmatmul.mubr.msk.f32.vlgmr.msra.gmra.mxu1 %vm382_vm1, %v761_v53  ;;  %4224 = vmatpush3.msk.msra.mxu0 %vm479_vm0, %v4628_v10  ;;  %v1179_v10 = vrot.slane %v4667_v17, 2  ;;  %v782_v53 = vrot.slane %v4707_v25, 1  ;;  %6333 = vst [vmem:[#allocation20_spill] sm:$0xff] %v4908_v49 }
  0x36   : > { %4174 = vmatpush3.msk.msra.mxu1 %vm479_vm0, %v4623_v9  ;;  %4078 = vmatprep.mubr.msk.f32.mxu1 %vm382_vm1, %v4792_v60  ;;  %v773_v9 = vrot.slane %v4681_v19, 1 }
  0x37   : > { %4128 = vmatprep.mubr.msk.f32.mxu0 %vm382_vm1, %v4795_v61  ;;  %4273 = vmatprep.subr.msk.mxu1 %vm479_vm0, %v4806_v0  ;;  %v4858_v48 = vsel %vm1163_vm3, %v1179_v10, %v1180_v35  ;;  %v787_v10 = vrot.slane %v4727_v29, 1  ;;  %v788_v35 = vrot.slane %v4743_v33, 1  ;;  %v808_v61 = vrot.slane %v4664_v16, 1 }
  0x38   : > { %4323 = vmatprep.subr.msk.mxu0 %vm479_vm0, %v4811_v1  ;;  %4129 = vmatmul.mubr.msk.f32.gmra.mxu0 %vm382_vm1, %v4821_v3  ;;  %v4855_v47 = vsel %vm756_vm2, %v772_v63, %v773_v9  ;;  %6329 = vst [vmem:[#allocation16_spill] sm:$0xff] %v4858_v48  ;;  %v4876_v54 = vsel %vm756_vm2, %v773_v9, %v775_v45  ;;  %v783_v63 = vrot.slane %v4721_v27, 1  ;;  %v785_v9 = vrot.slane %v337_v58, 1 }
  0x39   : > { %4079 = vmatmul.mubr.msk.f32.gmra.mxu1 %vm382_vm1, %v4818_v2  ;;  %4131 = vmatprep.mubr.msk.f32.mxu0 %vm382_vm1, %v4828_v32  ;;  %v1192_v45 = vrot.slane %v337_v58, 2  ;;  %v4921_v50 = vsel %vm756_vm2, %v787_v10, %v788_v35  ;;  %v792_v58 = vrot.slane %v4751_v37, 1  ;;  %v1199_v10 = vrot.slane %v4751_v37, 2 }
  0x3a   : > { %4081 = vmatprep.mubr.msk.f32.mxu1 %vm382_vm1, %v4800_v62  ;;  %v4905_v46 = vsel %vm756_vm2, %v782_v53, %v783_v63  ;;  %v4918_v42 = vsel %vm756_vm2, %v783_v63, %v785_v9  ;;  %v793_v9 = vrot.slane %v4766_v40, 1  ;;  %v1204_v3 = vrot.slane %v4598_v4, 2 }
  0x3b   : > { %v4928_v53 = vsel %vm1163_vm3, %v1190_v31, %v1192_v45  ;;  %v797_v31 = vrot.slane %v4598_v4, 1 }
  0x3c   : > { %4132 = vmatmul.mubr.msk.f32.gmra.mxu0 %vm382_vm1, %v4852_v44  ;;  %6334 = vst [vmem:[#allocation21_spill] sm:$0xff] %v4928_v53  ;;  %v4956_v44 = vsel %vm756_vm2, %v792_v58, %v793_v9 }
  0x3d   : > { %4082 = vmatmul.mubr.msk.f32.gmra.mxu1 %vm382_vm1, %v4849_v43  ;;  %4134 = vmatprep.mubr.msk.f32.mxu0 %vm382_vm1, %v4858_v48  ;;  %v340_v48 = vld [vmem:[%s4592_s28 + $0xa0] sm:$0x3] }
  0x3e   : > { %4084 = vmatprep.mubr.msk.f32.mxu1 %vm382_vm1, %v4855_v47  ;;  %v790_v56 = vrot.slane %v340_v48, 1  ;;  %v1197_v57 = vrot.slane %v340_v48, 2  ;;  %v795_v48 = vrot.slane %v343_v5, 1 }
  0x40   : > { %4135 = vmatmul.mubr.msk.f32.gmra.mxu0 %vm382_vm1, %v4879_v55  ;;  %v1195_v55 = vrot.slane %v4743_v33, 2  ;;  %v4948_v45 = vsel %vm756_vm2, %v788_v35, %v790_v56 }
  0x41   : > { %4085 = vmatmul.mubr.msk.f32.gmra.mxu1 %vm382_vm1, %v4876_v54  ;;  %4137 = vmatprep.mubr.msk.f32.mxu0 %vm382_vm1, %v4883_v59  ;;  %v798_v59 = vrot.slane %v4608_v6, 1 }
  0x42   : > { %4087 = vmatprep.mubr.msk.f32.mxu1 %vm382_vm1, %v4868_v52  ;;  %v4933_v63 = vsel %vm1163_vm3, %v1194_v51, %v1195_v55  ;;  %v4951_v51 = vsel %vm1163_vm3, %v1195_v55, %v1197_v57  ;;  %v4968_v55 = vsel %vm756_vm2, %v793_v9, %v795_v48  ;;  %v803_v48 = vrot.slane %v4636_v12, 1 }
  0x43   : > { %6335 = vst [vmem:[#allocation22_spill] sm:$0xff] %v4933_v63  ;;  %6336 = vst [vmem:[#allocation23_spill] sm:$0xff] %v4951_v51  ;;  %v4978_v57 = vsel %vm756_vm2, %v797_v31, %v798_v59  ;;  %v807_v31 = vrot.slane %v4646_v14, 1 }
  0x44   : > { %4138 = vmatmul.mubr.msk.f32.gmra.mxu0 %vm382_vm1, %v4902_v39  ;;  %v1200_v39 = vrot.slane %v4766_v40, 2 }
  0x45   : > { %4088 = vmatmul.mubr.msk.f32.gmra.mxu1 %vm382_vm1, %v4899_v36  ;;  %4140 = vmatprep.mubr.msk.f32.mxu0 %vm382_vm1, %v4908_v49  ;;  %v1202_v49 = vrot.slane %v343_v5, 2  ;;  %v802_v5 = vrot.slane %v4618_v8, 1 }
  0x46   : > { %4090 = vmatprep.mubr.msk.f32.mxu1 %vm382_vm1, %v4905_v46  ;;  %v4959_v32 = vsel %vm1163_vm3, %v1199_v10, %v1200_v39  ;;  %v349_v10 = vld [vmem:[%s4592_s28 + $0xe8] sm:$0x3] }
  0x47   : > { %6337 = vst [vmem:[#allocation24_spill] sm:$0xff] %v4959_v32  ;;  %v4975_v56 = vsel %vm1163_vm3, %v1200_v39, %v1202_v49  ;;  %v805_v39 = vrot.slane %v349_v10, 1  ;;  %v1212_v49 = vrot.slane %v349_v10, 2 }
  0x48   : > { %4141 = vmatmul.mubr.msk.f32.gmra.mxu0 %vm382_vm1, %v4928_v53  ;;  %v346_v53 = vld [vmem:[%s4592_s28 + $0xd0] sm:$0x3]  ;;  %6338 = vst [vmem:[#allocation25_spill] sm:$0xff] %v4975_v56 }
  0x49   : > { %4091 = vmatmul.mubr.msk.f32.gmra.mxu1 %vm382_vm1, %v4918_v42  ;;  %4143 = vmatprep.mubr.msk.f32.mxu0 %vm382_vm1, %v4933_v63  ;;  %v1205_v63 = vrot.slane %v4608_v6, 2  ;;  %v800_v35 = vrot.slane %v346_v53, 1  ;;  %v1207_v58 = vrot.slane %v346_v53, 2 }
  0x4a   : > { %4093 = vmatprep.mubr.msk.f32.mxu1 %vm382_vm1, %v4921_v50 }
  0x4b   : > { %v4983_v9 = vsel %vm1163_vm3, %v1204_v3, %v1205_v63  ;;  %v4997_v3 = vsel %vm756_vm2, %v798_v59, %v800_v35  ;;  %v5000_v53 = vsel %vm1163_vm3, %v1205_v63, %v1207_v58  ;;  %v352_v59 = vld [vmem:[%s4592_s28 + $0x100] sm:$0x3]  ;;  %v5018_v63 = vsel %vm756_vm2, %v803_v48, %v805_v39 }
  0x4c   : > { %4144 = vmatmul.mubr.msk.f32.gmra.mxu0 %vm382_vm1, %v4951_v51  ;;  %6339 = vst [vmem:[#allocation26_spill] sm:$0xff] %v4983_v9  ;;  %v1209_v51 = vrot.slane %v4618_v8, 2  ;;  %6340 = vst [vmem:[#allocation27_spill] sm:$0xff] %v5000_v53  ;;  %v810_v58 = vrot.slane %v352_v59, 1  ;;  %v1219_v39 = vrot.slane %v4670_v18, 2 }
  0x4d   : > { %4094 = vmatmul.mubr.msk.f32.gmra.mxu1 %vm382_vm1, %v4948_v45  ;;  %4146 = vmatprep.mubr.msk.f32.mxu0 %vm382_vm1, %v4959_v32  ;;  %v1210_v32 = vrot.slane %v4636_v12, 2  ;;  %v1214_v12 = vrot.slane %v4646_v14, 2 }
  0x4e   : > { %4096 = vmatprep.mubr.msk.f32.mxu1 %vm382_vm1, %v4956_v44 }
  0x4f   : > { %v5008_v10 = vsel %vm1163_vm3, %v1209_v51, %v1210_v32  ;;  %v5021_v35 = vsel %vm1163_vm3, %v1210_v32, %v1212_v49  ;;  %v5028_v51 = vsel %vm756_vm2, %v807_v31, %v808_v61  ;;  %v813_v32 = vrot.slane %v4684_v20, 1 }
  0x50   : > { %4147 = vmatmul.mubr.msk.f32.gmra.mxu0 %vm382_vm1, %v4975_v56  ;;  %v5005_v56 = vsel %vm756_vm2, %v802_v5, %v803_v48  ;;  %6341 = vst [vmem:[#allocation28_spill] sm:$0xff] %v5008_v10  ;;  %6342 = vst [vmem:[#allocation29_spill] sm:$0xff] %v5021_v35  ;;  %v1217_v5 = vrot.slane %v352_v59, 2  ;;  %v1220_v49 = vrot.slane %v4684_v20, 2  ;;  %v817_v20 = vrot.slane %v4690_v22, 1 }
  0x51   : > { %4097 = vmatmul.mubr.msk.f32.gmra.mxu1 %vm382_vm1, %v4968_v55  ;;  %4149 = vmatprep.mubr.msk.f32.mxu0 %vm382_vm1, %v4983_v9  ;;  %v1215_v9 = vrot.slane %v4664_v16, 2  ;;  %6343 = vst [vmem:[#allocation30_spill] sm:$0xff] %v5028_v51  ;;  %v812_v16 = vrot.slane %v4670_v18, 1  ;;  %v818_v18 = vrot.slane %v4704_v24, 1 }
  0x52   : > { %4099 = vmatprep.mubr.msk.f32.mxu1 %vm382_vm1, %v4978_v57 }
  0x53   : > { %v5033_v48 = vsel %vm1163_vm3, %v1214_v12, %v1215_v9  ;;  %v5047_v12 = vsel %vm756_vm2, %v808_v61, %v810_v58  ;;  %v358_v61 = vld [vmem:[%s4592_s28 + $0x130] sm:$0x3]  ;;  %v5078_v58 = vsel %vm756_vm2, %v817_v20, %v818_v18 }
  0x54   : > { %4150 = vmatmul.mubr.msk.f32.gmra.mxu0 %vm382_vm1, %v5000_v53  ;;  %v355_v53 = vld [vmem:[%s4592_s28 + $0x118] sm:$0x3]  ;;  %6344 = vst [vmem:[#allocation31_spill] sm:$0xff] %v5033_v48  ;;  %6350 = vst [vmem:[#allocation37_spill] sm:$0xff] %v5078_v58 }
  0x55   : > { %4100 = vmatmul.mubr.msk.f32.gmra.mxu1 %vm382_vm1, %v4997_v3  ;;  %4152 = vmatprep.mubr.msk.f32.mxu0 %vm382_vm1, %v5008_v10  ;;  %v815_v31 = vrot.slane %v355_v53, 1  ;;  %v1222_v59 = vrot.slane %v355_v53, 2  ;;  %v5050_v10 = vsel %vm1163_vm3, %v1215_v9, %v1217_v5  ;;  %v5058_v53 = vsel %vm1163_vm3, %v1219_v39, %v1220_v49 }
  0x56   : > { %4102 = vmatprep.mubr.msk.f32.mxu1 %vm382_vm1, %v5005_v56  ;;  %6345 = vst [vmem:[#allocation32_spill] sm:$0xff] %v5050_v10  ;;  %6347 = vst [vmem:[#allocation34_spill] sm:$0xff] %v5058_v53  ;;  %v820_v5 = vrot.slane %v358_v61, 1  ;;  %v1227_v39 = vrot.slane %v358_v61, 2 }
  0x57   : > { %v5068_v9 = vsel %vm756_vm2, %v813_v32, %v815_v31  ;;  %v1229_v31 = vrot.slane %v4710_v26, 2 }
  0x58   : > { %4153 = vmatmul.mubr.msk.f32.gmra.mxu0 %vm382_vm1, %v5021_v35  ;;  %v5055_v35 = vsel %vm756_vm2, %v812_v16, %v813_v32  ;;  %6348 = vst [vmem:[#allocation35_spill] sm:$0xff] %v5068_v9  ;;  %v5071_v16 = vsel %vm1163_vm3, %v1220_v49, %v1222_v59  ;;  %v823_v49 = vrot.slane %v4724_v28, 1  ;;  %v1230_v59 = vrot.slane %v4724_v28, 2 }
  0x59   : > { %4103 = vmatmul.mubr.msk.f32.gmra.mxu1 %vm382_vm1, %v5018_v63  ;;  %4155 = vmatprep.mubr.msk.f32.mxu0 %vm382_vm1, %v5033_v48  ;;  %6346 = vst [vmem:[#allocation33_spill] sm:$0xff] %v5055_v35  ;;  %v1225_v48 = vrot.slane %v4704_v24, 2  ;;  %6349 = vst [vmem:[#allocation36_spill] sm:$0xff] %v5071_v16  ;;  %v822_v24 = vrot.slane %v4710_v26, 1  ;;  %v827_v28 = vrot.slane %v4730_v30, 1  ;;  %v828_v26 = vrot.slane %v4746_v34, 1 }
  0x5a   : > { %4105 = vmatprep.mubr.msk.f32.mxu1 %vm382_vm1, %v5028_v51  ;;  %v1224_v51 = vrot.slane %v4690_v22, 2 }
  0x5c   : > { %4156 = vmatmul.mubr.msk.f32.gmra.mxu0 %vm382_vm1, %v5050_v10  ;;  %v361_v10 = vld [vmem:[%s4592_s28 + $0x148] sm:$0x3]  ;;  %v5083_v32 = vsel %vm1163_vm3, %v1224_v51, %v1225_v48  ;;  %v5097_v51 = vsel %vm756_vm2, %v818_v18, %v820_v5  ;;  %v364_v18 = vld [vmem:[%s4592_s28 + $0x160] sm:$0x3]  ;;  %v5128_v5 = vsel %vm756_vm2, %v827_v28, %v828_v26 }
  0x5d   : > { %4106 = vmatmul.mubr.msk.f32.gmra.mxu1 %vm382_vm1, %v5047_v12  ;;  %4158 = vmatprep.mubr.msk.f32.mxu0 %vm382_vm1, %v5058_v53  ;;  %6351 = vst [vmem:[#allocation38_spill] sm:$0xff] %v5083_v32  ;;  %v825_v20 = vrot.slane %v361_v10, 1  ;;  %v1232_v61 = vrot.slane %v361_v10, 2  ;;  %6352 = vst [vmem:[#allocation39_spill] sm:$0xff] %v5097_v51  ;;  %v5100_v53 = vsel %vm1163_vm3, %v1225_v48, %v1227_v39  ;;  %v830_v39 = vrot.slane %v364_v18, 1 }
  0x5e   : > { %4108 = vmatprep.mubr.msk.f32.mxu1 %vm382_vm1, %v5055_v35  ;;  %6353 = vst [vmem:[#allocation40_spill] sm:$0xff] %v5100_v53  ;;  %v5108_v10 = vsel %vm1163_vm3, %v1229_v31, %v1230_v59  ;;  %6358 = vst [vmem:[#allocation45_spill] sm:$0xff] %v5128_v5  ;;  %v1237_v31 = vrot.slane %v364_v18, 2 }
  0x5f   : > { %6355 = vst [vmem:[#allocation42_spill] sm:$0xff] %v5108_v10  ;;  %v5118_v48 = vsel %vm756_vm2, %v823_v49, %v825_v20  ;;  %v1240_v20 = vrot.slane %v4769_v41, 2  ;;  %v5147_v28 = vsel %vm756_vm2, %v828_v26, %v830_v39  ;;  %v6371_v39 = vld [vmem:[#allocation6_spill] sm:$0xff] }
  0x60   : > { %4159 = vmatmul.mubr.msk.f32.gmra.mxu0 %vm382_vm1, %v5071_v16  ;;  %v5105_v16 = vsel %vm756_vm2, %v822_v24, %v823_v49  ;;  %6356 = vst [vmem:[#allocation43_spill] sm:$0xff] %v5118_v48  ;;  %v5121_v24 = vsel %vm1163_vm3, %v1230_v59, %v1232_v61  ;;  %v833_v49 = vrot.slane %v4769_v41, 1  ;;  %v1239_v59 = vrot.slane %v4754_v38, 2  ;;  %v367_v61 = vld [vmem:[%s4592_s28 + $0x178] sm:$0x3]  ;;  %6360 = vst [vmem:[#allocation47_spill] sm:$0xff] %v5147_v28 }
  0x61   : > { %4109 = vmatmul.mubr.msk.f32.gmra.mxu1 %vm382_vm1, %v5068_v9  ;;  %4161 = vmatprep.mubr.msk.f32.mxu0 %vm382_vm1, %v5083_v32  ;;  %6354 = vst [vmem:[#allocation41_spill] sm:$0xff] %v5105_v16  ;;  %v1235_v32 = vrot.slane %v4746_v34, 2  ;;  %6357 = vst [vmem:[#allocation44_spill] sm:$0xff] %v5121_v24  ;;  %v832_v34 = vrot.slane %v4754_v38, 1  ;;  %v835_v18 = vrot.slane %v367_v61, 1 }
  0x62   : > { %4111 = vmatprep.mubr.msk.f32.mxu1 %vm382_vm1, %v5078_v58  ;;  %v1234_v58 = vrot.slane %v4730_v30, 2  ;;  %v5156_v38 = vsel %vm1163_vm3, %v1239_v59, %v1240_v20  ;;  %v5305_v59 = vld [vmem:[%s5295_s22 + $0x8] sm:$0xff] }
  0x63   : > { %v5153_v41 = vsel %vm756_vm2, %v832_v34, %v833_v49  ;;  %v5167_v26 = vsel %vm756_vm2, %v833_v49, %v835_v18  ;;  %v5302_v49 = vld [vmem:[%s5295_s22] sm:$0xff]  ;;  %v1840_v18 = vrot.slane %v5305_v59, 1 }
  0x64   : > { %4162 = vmatmul.mubr.msk.f32.gmra.mxu0 %vm382_vm1, %v5100_v53  ;;  %v5132_v53 = vsel %vm1163_vm3, %v1234_v58, %v1235_v32  ;;  %v5150_v58 = vsel %vm1163_vm3, %v1235_v32, %v1237_v31  ;;  %6362 = vst [vmem:[#allocation49_spill] sm:$0xff] %v5153_v41  ;;  %6363 = vst [vmem:[#allocation50_spill] sm:$0xff] %v5167_v26  ;;  %v5187_v32 = vld [vmem:[%s6219_s2 + $0x1c] sm:$0xf]  ;;  %v6372_v31 = vld [vmem:[#allocation7_spill] sm:$0xff] }
  0x65   : > { %4112 = vmatmul.mubr.msk.f32.gmra.mxu1 %vm382_vm1, %v5097_v51  ;;  %4164 = vmatprep.mubr.msk.f32.mxu0 %vm382_vm1, %v5108_v10  ;;  %6359 = vst [vmem:[#allocation46_spill] sm:$0xff] %v5132_v53  ;;  %6361 = vst [vmem:[#allocation48_spill] sm:$0xff] %v5150_v58  ;;  %v1242_v10 = vrot.slane %v367_v61, 2  ;;  %v1839_v61 = vrot.slane %v5302_v49, 1 }
  0x66   : > { %4114 = vmatprep.mubr.msk.f32.mxu1 %vm382_vm1, %v5105_v16 }
  0x67   : > { %v5170_v34 = vsel %vm1163_vm3, %v1240_v20, %v1242_v10  ;;  %v5192_v10 = vld [vmem:[%s6219_s2 + $0x20] sm:$0xf]  ;;  %v6373_v20 = vld [vmem:[#allocation8_spill] sm:$0xff] }
  0x68   : > { %4165 = vmatmul.mubr.msk.f32.gmra.mxu0 %vm382_vm1, %v5121_v24  ;;  %6364 = vst [vmem:[#allocation51_spill] sm:$0xff] %v5170_v34 }
  0x69   : > { %4115 = vmatmul.mubr.msk.f32.gmra.mxu1 %vm382_vm1, %v5118_v48  ;;  %4167 = vmatprep.mubr.msk.f32.mxu0 %vm382_vm1, %v5132_v53 }
  0x6a   : > { %4117 = vmatprep.mubr.msk.f32.mxu1 %vm382_vm1, %v5128_v5 }
  0x6c   : > { %4168 = vmatmul.mubr.msk.f32.gmra.mxu0 %vm382_vm1, %v5150_v58 }
  0x6d   : > { %4118 = vmatmul.mubr.msk.f32.gmra.mxu1 %vm382_vm1, %v5147_v28  ;;  %4170 = vmatprep.mubr.msk.f32.mxu0 %vm382_vm1, %v5156_v38 }
  0x6e   : > { %4120 = vmatprep.mubr.msk.f32.mxu1 %vm382_vm1, %v5153_v41 }
  0x70   : > { %4171 = vmatmul.mubr.msk.f32.gmra.mxu0 %vm382_vm1, %v5170_v34 }
  0x71   : > { %4121 = vmatmul.mubr.msk.f32.gmra.mxu1 %vm382_vm1, %v5167_v26  ;;  %4225 = vmatprep.mubr.msk.f32.mxu0 %vm382_vm1, %v4792_v60  ;;  %v6367_v60 = vld [vmem:[#allocation3_spill] sm:$0xff] }
  0x72   : > { %4175 = vmatprep.mubr.msk.f32.mxu1 %vm382_vm1, %v4611_v7  ;;  %v6365_v7 = vld [vmem:[#allocation2_spill] sm:$0xff] }
  0x74   : > { %4226 = vmatmul.mubr.msk.f32.vlgmr.msra.gmra.mxu0 %vm382_vm1, %v4818_v2  ;;  %v6370_v2 = vld [vmem:[#allocation37_spill] sm:$0xff] }
  0x75   : > { %4176 = vmatmul.mubr.msk.f32.vlgmr.msra.gmra.mxu1 %vm382_vm1, %v4633_v11  ;;  %4324 = vmatpush3.msk.msra.mxu0 %vm479_vm0, %v4811_v1  ;;  %v6366_v11 = vld [vmem:[#allocation30_spill] sm:$0xff]  ;;  %v6369_v1 = vld [vmem:[#allocation5_spill] sm:$0xff] }
  0x76   : > { %4274 = vmatpush3.msk.msra.mxu1 %vm479_vm0, %v4806_v0  ;;  %4178 = vmatprep.mubr.msk.f32.mxu1 %vm382_vm1, %v4643_v13  ;;  %v6368_v0 = vld [vmem:[#allocation4_spill] sm:$0xff] }
  0x77   : > { %4228 = vmatprep.mubr.msk.f32.mxu0 %vm382_vm1, %v4800_v62  ;;  %4373 = vmatprep.subr.msk.mxu1 %vm479_vm0, %v5187_v32 }
  0x78   : > { %4423 = vmatprep.subr.msk.mxu0 %vm479_vm0, %v5192_v10  ;;  %4229 = vmatmul.mubr.msk.f32.gmra.mxu0 %vm382_vm1, %v4849_v43 }
  0x79   : > { %4179 = vmatmul.mubr.msk.f32.gmra.mxu1 %vm382_vm1, %v4661_v15  ;;  %4231 = vmatprep.mubr.msk.f32.mxu0 %vm382_vm1, %v4855_v47 }
  0x7a   : > { %4181 = vmatprep.mubr.msk.f32.mxu1 %vm382_vm1, %v4667_v17 }
  0x7c   : > { %4232 = vmatmul.mubr.msk.f32.gmra.mxu0 %vm382_vm1, %v4876_v54 }
  0x7d   : > { %4182 = vmatmul.mubr.msk.f32.gmra.mxu1 %vm382_vm1, %v4681_v19  ;;  %4234 = vmatprep.mubr.msk.f32.mxu0 %vm382_vm1, %v4868_v52 }
  0x7e   : > { %4184 = vmatprep.mubr.msk.f32.mxu1 %vm382_vm1, %v4687_v21 }
  0x80   : > { %4235 = vmatmul.mubr.msk.f32.gmra.mxu0 %vm382_vm1, %v4899_v36 }
  0x81   : > { %4185 = vmatmul.mubr.msk.f32.gmra.mxu1 %vm382_vm1, %v4701_v23  ;;  %4237 = vmatprep.mubr.msk.f32.mxu0 %vm382_vm1, %v4905_v46 }
  0x82   : > { %4187 = vmatprep.mubr.msk.f32.mxu1 %vm382_vm1, %v4707_v25 }
  0x84   : > { %4238 = vmatmul.mubr.msk.f32.gmra.mxu0 %vm382_vm1, %v4918_v42 }
  0x85   : > { %4188 = vmatmul.mubr.msk.f32.gmra.mxu1 %vm382_vm1, %v4721_v27  ;;  %4240 = vmatprep.mubr.msk.f32.mxu0 %vm382_vm1, %v4921_v50 }
  0x86   : > { %4190 = vmatprep.mubr.msk.f32.mxu1 %vm382_vm1, %v4727_v29 }
  0x88   : > { %4241 = vmatmul.mubr.msk.f32.gmra.mxu0 %vm382_vm1, %v4948_v45 }
  0x89   : > { %4191 = vmatmul.mubr.msk.f32.gmra.mxu1 %vm382_vm1, %v4743_v33  ;;  %4243 = vmatprep.mubr.msk.f32.mxu0 %vm382_vm1, %v4956_v44 }
  0x8a   : > { %4193 = vmatprep.mubr.msk.f32.mxu1 %vm382_vm1, %v4751_v37 }
  0x8c   : > { %4244 = vmatmul.mubr.msk.f32.gmra.mxu0 %vm382_vm1, %v4968_v55 }
  0x8d   : > { %4194 = vmatmul.mubr.msk.f32.gmra.mxu1 %vm382_vm1, %v4766_v40  ;;  %4246 = vmatprep.mubr.msk.f32.mxu0 %vm382_vm1, %v4978_v57 }
  0x8e   : > { %4196 = vmatprep.mubr.msk.f32.mxu1 %vm382_vm1, %v4598_v4 }
  0x90   : > { %4247 = vmatmul.mubr.msk.f32.gmra.mxu0 %vm382_vm1, %v4997_v3 }
  0x91   : > { %4197 = vmatmul.mubr.msk.f32.gmra.mxu1 %vm382_vm1, %v4608_v6  ;;  %4249 = vmatprep.mubr.msk.f32.mxu0 %vm382_vm1, %v5005_v56 }
  0x92   : > { %4199 = vmatprep.mubr.msk.f32.mxu1 %vm382_vm1, %v4618_v8 }
  0x94   : > { %4250 = vmatmul.mubr.msk.f32.gmra.mxu0 %vm382_vm1, %v5018_v63 }
  0x95   : > { %4200 = vmatmul.mubr.msk.f32.gmra.mxu1 %vm382_vm1, %v6365_v7  ;;  %4252 = vmatprep.mubr.msk.f32.mxu0 %vm382_vm1, %v6366_v11 }
  0x96   : > { %4202 = vmatprep.mubr.msk.f32.mxu1 %vm382_vm1, %v4646_v14 }
  0x98   : > { %4253 = vmatmul.mubr.msk.f32.gmra.mxu0 %vm382_vm1, %v5047_v12 }
  0x99   : > { %4203 = vmatmul.mubr.msk.f32.gmra.mxu1 %vm382_vm1, %v6367_v60  ;;  %4255 = vmatprep.mubr.msk.f32.mxu0 %vm382_vm1, %v5055_v35 }
  0x9a   : > { %4205 = vmatprep.mubr.msk.f32.mxu1 %vm382_vm1, %v6368_v0 }
  0x9c   : > { %4256 = vmatmul.mubr.msk.f32.gmra.mxu0 %vm382_vm1, %v5068_v9  ;;  %v6377_v9 = vld [vmem:[#allocation11_spill] sm:$0xff] }
  0x9d   : > { %4206 = vmatmul.mubr.msk.f32.gmra.mxu1 %vm382_vm1, %v6369_v1  ;;  %4258 = vmatprep.mubr.msk.f32.mxu0 %vm382_vm1, %v6370_v2  ;;  %v6375_v2 = vld [vmem:[#allocation10_spill] sm:$0xff] }
  0x9e   : > { %4208 = vmatprep.mubr.msk.f32.mxu1 %vm382_vm1, %v4690_v22 }
  0xa0   : > { %4259 = vmatmul.mubr.msk.f32.gmra.mxu0 %vm382_vm1, %v5097_v51  ;;  %v6374_v51 = vld [vmem:[#allocation9_spill] sm:$0xff] }
  0xa1   : > { %4209 = vmatmul.mubr.msk.f32.gmra.mxu1 %vm382_vm1, %v6371_v39  ;;  %4261 = vmatprep.mubr.msk.f32.mxu0 %vm382_vm1, %v5105_v16  ;;  %v5318_v16 = vld [vmem:[%s5295_s22 + $0x10] sm:$0x3] }
  0xa2   : > { %4211 = vmatprep.mubr.msk.f32.mxu1 %vm382_vm1, %v6372_v31 }
  0xa4   : > { %4262 = vmatmul.mubr.msk.f32.gmra.mxu0 %vm382_vm1, %v5118_v48  ;;  %v5330_v48 = vsel %vm756_vm2, %v1839_v61, %v1840_v18  ;;  %v6379_v61 = vld [vmem:[#allocation12_spill] sm:$0xff] }
  0xa5   : > { %4212 = vmatmul.mubr.msk.f32.gmra.mxu1 %vm382_vm1, %v6373_v20  ;;  %4264 = vmatprep.mubr.msk.f32.mxu0 %vm382_vm1, %v5128_v5  ;;  %v1842_v5 = vrot.slane %v5318_v16, 1  ;;  %6376 = vst [vmem:[#allocation2_spill] sm:$0xff] %v5330_v48 }
  0xa6   : > { %4214 = vmatprep.mubr.msk.f32.mxu1 %vm382_vm1, %v4730_v30 }
  0xa8   : > { %4265 = vmatmul.mubr.msk.f32.gmra.mxu0 %vm382_vm1, %v5147_v28  ;;  %v5341_v28 = vsel %vm756_vm2, %v1840_v18, %v1842_v5  ;;  %v6381_v5 = vld [vmem:[#allocation14_spill] sm:$0xff]  ;;  %v6382_v18 = vld [vmem:[#allocation15_spill] sm:$0xff] }
  0xa9   : > { %4215 = vmatmul.mubr.msk.f32.gmra.mxu1 %vm382_vm1, %v6374_v51  ;;  %4267 = vmatprep.mubr.msk.f32.mxu0 %vm382_vm1, %v5153_v41  ;;  %6378 = vst [vmem:[#allocation30_spill] sm:$0xff] %v5341_v28 }
  0xaa   : > { %4217 = vmatprep.mubr.msk.f32.mxu1 %vm382_vm1, %v6375_v2 }
  0xac   : > { %4268 = vmatmul.mubr.msk.f32.gmra.mxu0 %vm382_vm1, %v5167_v26  ;;  %v6380_v26 = vld [vmem:[#allocation13_spill] sm:$0xff] }
  0xad   : > { %4218 = vmatmul.mubr.msk.f32.gmra.mxu1 %vm382_vm1, %v6377_v9  ;;  %4270 = vmatprep.mubr.msk.f32.mxu0 %vm382_vm1, %v5330_v48 }
  0xae   : > { %4220 = vmatprep.mubr.msk.f32.mxu1 %vm382_vm1, %v5302_v49 }
  0xb0   : > { %4271 = vmatmul.mubr.msk.f32.gmra.mxu0 %vm382_vm1, %v5341_v28  ;;  %v6400_v28 = vld [vmem:[#allocation32_spill] sm:$0xff] }
  0xb1   : > { %4221 = vmatmul.mubr.msk.f32.gmra.mxu1 %vm382_vm1, %v5305_v59  ;;  %4325 = vmatprep.mubr.msk.f32.mxu0 %vm382_vm1, %v4643_v13  ;;  %v6383_v13 = vld [vmem:[#allocation16_spill] sm:$0xff] }
  0xb2   : > { %4275 = vmatprep.mubr.msk.f32.mxu1 %vm382_vm1, %v6379_v61 }
  0xb4   : > { %4326 = vmatmul.mubr.msk.f32.vlgmr.msra.gmra.mxu0 %vm382_vm1, %v4661_v15  ;;  %v6384_v15 = vld [vmem:[#allocation17_spill] sm:$0xff] }
  0xb5   : > { %4276 = vmatmul.mubr.msk.f32.vlgmr.msra.gmra.mxu1 %vm382_vm1, %v6380_v26  ;;  %4424 = vmatpush3.msk.msra.mxu0 %vm479_vm0, %v5192_v10  ;;  %v6385_v26 = vld [vmem:[#allocation18_spill] sm:$0xff] }
  0xb6   : > { %4374 = vmatpush3.msk.msra.mxu1 %vm479_vm0, %v5187_v32  ;;  %4278 = vmatprep.mubr.msk.f32.mxu1 %vm382_vm1, %v6381_v5  ;;  %v6396_v32 = vld [vmem:[#allocation29_spill] sm:$0xff] }
  0xb7   : > { %4328 = vmatprep.mubr.msk.f32.mxu0 %vm382_vm1, %v4667_v17  ;;  %v6386_v17 = vld [vmem:[#allocation19_spill] sm:$0xff] }
  0xb8   : > { %4329 = vmatmul.mubr.msk.f32.gmra.mxu0 %vm382_vm1, %v4681_v19  ;;  %v6387_v19 = vld [vmem:[#allocation20_spill] sm:$0xff] }
  0xb9   : > { %4279 = vmatmul.mubr.msk.f32.gmra.mxu1 %vm382_vm1, %v6382_v18  ;;  %4331 = vmatprep.mubr.msk.f32.mxu0 %vm382_vm1, %v4687_v21  ;;  %v6388_v21 = vld [vmem:[#allocation21_spill] sm:$0xff] }
  0xba   : > { %4281 = vmatprep.mubr.msk.f32.mxu1 %vm382_vm1, %v6383_v13 }
  0xbc   : > { %4332 = vmatmul.mubr.msk.f32.gmra.mxu0 %vm382_vm1, %v4701_v23  ;;  %v6389_v23 = vld [vmem:[#allocation22_spill] sm:$0xff] }
  0xbd   : > { %4282 = vmatmul.mubr.msk.f32.gmra.mxu1 %vm382_vm1, %v6384_v15  ;;  %4334 = vmatprep.mubr.msk.f32.mxu0 %vm382_vm1, %v4707_v25  ;;  %v6390_v25 = vld [vmem:[#allocation23_spill] sm:$0xff] }
  0xbe   : > { %4284 = vmatprep.mubr.msk.f32.mxu1 %vm382_vm1, %v6385_v26 }
  0xc0   : > { %4335 = vmatmul.mubr.msk.f32.gmra.mxu0 %vm382_vm1, %v4721_v27  ;;  %v6391_v27 = vld [vmem:[#allocation24_spill] sm:$0xff] }
  0xc1   : > { %4285 = vmatmul.mubr.msk.f32.gmra.mxu1 %vm382_vm1, %v6386_v17  ;;  %4337 = vmatprep.mubr.msk.f32.mxu0 %vm382_vm1, %v4727_v29  ;;  %v6392_v29 = vld [vmem:[#allocation25_spill] sm:$0xff] }
  0xc2   : > { %4287 = vmatprep.mubr.msk.f32.mxu1 %vm382_vm1, %v6387_v19 }
  0xc4   : > { %4338 = vmatmul.mubr.msk.f32.gmra.mxu0 %vm382_vm1, %v4743_v33  ;;  %v6393_v33 = vld [vmem:[#allocation26_spill] sm:$0xff] }
  0xc5   : > { %4288 = vmatmul.mubr.msk.f32.gmra.mxu1 %vm382_vm1, %v6388_v21  ;;  %4340 = vmatprep.mubr.msk.f32.mxu0 %vm382_vm1, %v4751_v37  ;;  %v6394_v37 = vld [vmem:[#allocation27_spill] sm:$0xff] }
  0xc6   : > { %4290 = vmatprep.mubr.msk.f32.mxu1 %vm382_vm1, %v6389_v23 }
  0xc8   : > { %4341 = vmatmul.mubr.msk.f32.gmra.mxu0 %vm382_vm1, %v4766_v40  ;;  %v6395_v40 = vld [vmem:[#allocation28_spill] sm:$0xff] }
  0xc9   : > { %4291 = vmatmul.mubr.msk.f32.gmra.mxu1 %vm382_vm1, %v6390_v25  ;;  %4343 = vmatprep.mubr.msk.f32.mxu0 %vm382_vm1, %v4598_v4 }
  0xca   : > { %4293 = vmatprep.mubr.msk.f32.mxu1 %vm382_vm1, %v6391_v27 }
  0xcc   : > { %4344 = vmatmul.mubr.msk.f32.gmra.mxu0 %vm382_vm1, %v4608_v6 }
  0xcd   : > { %4294 = vmatmul.mubr.msk.f32.gmra.mxu1 %vm382_vm1, %v6392_v29  ;;  %4346 = vmatprep.mubr.msk.f32.mxu0 %vm382_vm1, %v4618_v8  ;;  %v6397_v8 = vld [vmem:[#allocation31_spill] sm:$0xff] }
  0xce   : > { %4296 = vmatprep.mubr.msk.f32.mxu1 %vm382_vm1, %v6393_v33 }
  0xd0   : > { %4347 = vmatmul.mubr.msk.f32.gmra.mxu0 %vm382_vm1, %v6365_v7 }
  0xd1   : > { %4297 = vmatmul.mubr.msk.f32.gmra.mxu1 %vm382_vm1, %v6394_v37  ;;  %4349 = vmatprep.mubr.msk.f32.mxu0 %vm382_vm1, %v4646_v14 }
  0xd2   : > { %4299 = vmatprep.mubr.msk.f32.mxu1 %vm382_vm1, %v6395_v40 }
  0xd4   : > { %v5419_v4 = vpop.f32.mrf.mxu0  ;;  %4350 = vmatmul.mubr.msk.f32.gmra.mxu0 %vm382_vm1, %v6367_v60  ;;  %v6401_v60 = vld [vmem:[#allocation34_spill] sm:$0xff] }
  0xd5   : > { %v5421_v6 = vpop.f32.mrf.mxu1  ;;  %4300 = vmatmul.mubr.msk.f32.gmra.mxu1 %vm382_vm1, %v6396_v32  ;;  %4352 = vmatprep.mubr.msk.f32.mxu0 %vm382_vm1, %v6368_v0 }
  0xd6   : > { %4302 = vmatprep.mubr.msk.f32.mxu1 %vm382_vm1, %v6397_v8  ;;  %v5431_v10 = vpop.f32.mrf.mxu0 }
  0xd7   : > { %v5433_v7 = vpop.f32.mrf.mxu1 }
  0xd8   : > { %6398 = vst [vmem:[#allocation3_spill] sm:$0xff] %v5433_v7  ;;  %v5435_v14 = vpop.f32.mrf.mxu0  ;;  %4353 = vmatmul.mubr.msk.f32.gmra.mxu0 %vm382_vm1, %v6369_v1  ;;  %v6405_v1 = vld [vmem:[#allocation38_spill] sm:$0xff] }
  0xd9   : > { %v5437_v61 = vpop.f32.mrf.mxu1  ;;  %4303 = vmatmul.mubr.msk.f32.gmra.mxu1 %vm382_vm1, %v6400_v28  ;;  %4355 = vmatprep.mubr.msk.f32.mxu0 %vm382_vm1, %v4690_v22 }
  0xda   : > { %6399 = vst [vmem:[#allocation4_spill] sm:$0xff] %v5437_v61  ;;  %4305 = vmatprep.mubr.msk.f32.mxu1 %vm382_vm1, %v6401_v60  ;;  %v5447_v0 = vpop.f32.mrf.mxu0  ;;  %v6404_v61 = vld [vmem:[#allocation36_spill] sm:$0xff] }
  0xdb   : > { %v5449_v48 = vpop.f32.mrf.mxu1 }
  0xdc   : > { %6402 = vst [vmem:[#allocation5_spill] sm:$0xff] %v5449_v48  ;;  %v5451_v41 = vpop.f32.mrf.mxu0  ;;  %4356 = vmatmul.mubr.msk.f32.gmra.mxu0 %vm382_vm1, %v6371_v39  ;;  %v6409_v39 = vld [vmem:[#allocation42_spill] sm:$0xff] }
  0xdd   : > { %v5453_v35 = vpop.f32.mrf.mxu1  ;;  %4306 = vmatmul.mubr.msk.f32.gmra.mxu1 %vm382_vm1, %v6404_v61  ;;  %4358 = vmatprep.mubr.msk.f32.mxu0 %vm382_vm1, %v6372_v31 }
  0xde   : > { %6403 = vst [vmem:[#allocation6_spill] sm:$0xff] %v5453_v35  ;;  %4308 = vmatprep.mubr.msk.f32.mxu1 %vm382_vm1, %v6405_v1  ;;  %v5463_v22 = vpop.f32.mrf.mxu0  ;;  %v6408_v35 = vld [vmem:[#allocation40_spill] sm:$0xff] }
  0xdf   : > { %v5465_v60 = vpop.f32.mrf.mxu1 }
  0xe0   : > { %6406 = vst [vmem:[#allocation7_spill] sm:$0xff] %v5465_v60  ;;  %v5467_v48 = vpop.f32.mrf.mxu0  ;;  %4359 = vmatmul.mubr.msk.f32.gmra.mxu0 %vm382_vm1, %v6373_v20 }
  0xe1   : > { %v5469_v7 = vpop.f32.mrf.mxu1  ;;  %4309 = vmatmul.mubr.msk.f32.gmra.mxu1 %vm382_vm1, %v6408_v35  ;;  %4361 = vmatprep.mubr.msk.f32.mxu0 %vm382_vm1, %v4730_v30  ;;  %v2110_v30 = vrot.slane %v5302_v49, 2 }
  0xe2   : > { %6407 = vst [vmem:[#allocation8_spill] sm:$0xff] %v5469_v7  ;;  %4311 = vmatprep.mubr.msk.f32.mxu1 %vm382_vm1, %v6409_v39  ;;  %v5479_v31 = vpop.f32.mrf.mxu0 }
  0xe3   : > { %v5481_v1 = vpop.f32.mrf.mxu1 }
  0xe4   : > { %6410 = vst [vmem:[#allocation9_spill] sm:$0xff] %v5481_v1  ;;  %v5483_v60 = vpop.f32.mrf.mxu0  ;;  %4362 = vmatmul.mubr.msk.f32.gmra.mxu0 %vm382_vm1, %v6374_v51  ;;  %v2113_v51 = vrot.slane %v5318_v16, 2 }
  0xe5   : > { %v5485_v61 = vpop.f32.mrf.mxu1  ;;  %4312 = vmatmul.mubr.msk.f32.gmra.mxu1 %vm382_vm1, %v5121_v24  ;;  %4364 = vmatprep.mubr.msk.f32.mxu0 %vm382_vm1, %v6375_v2 }
  0xe6   : > { %6411 = vst [vmem:[#allocation10_spill] sm:$0xff] %v5485_v61  ;;  %4314 = vmatprep.mubr.msk.f32.mxu1 %vm382_vm1, %v5132_v53  ;;  %v5496_v20 = vpop.f32.mrf.mxu0  ;;  %v2111_v61 = vrot.slane %v5305_v59, 2 }
  0xe7   : > { %v5498_v1 = vpop.f32.mrf.mxu1 }
  0xe8   : > { %6412 = vst [vmem:[#allocation11_spill] sm:$0xff] %v5498_v1  ;;  %v5501_v7 = vpop.f32.mrf.mxu0  ;;  %4365 = vmatmul.mubr.msk.f32.gmra.mxu0 %vm382_vm1, %v6377_v9  ;;  %v5537_v16 = vsel %vm1163_vm3, %v2111_v61, %v2113_v51 }
  0xe9   : > { %v5503_v24 = vpop.f32.mrf.mxu1  ;;  %4315 = vmatmul.mubr.msk.f32.gmra.mxu1 %vm382_vm1, %v5150_v58  ;;  %4367 = vmatprep.mubr.msk.f32.mxu0 %vm382_vm1, %v5302_v49  ;;  %v5522_v58 = vld [vmem:[%s5295_s22 + $0x18] sm:$0xff]  ;;  %6418 = vst [vmem:[#allocation17_spill] sm:$0xff] %v5537_v16  ;;  %v5540_v49 = vld [vmem:[%s5295_s22 + $0x20] sm:$0xff] }
  0xea   : > { %6413 = vst [vmem:[#allocation12_spill] sm:$0xff] %v5503_v24  ;;  %4317 = vmatprep.mubr.msk.f32.mxu1 %vm382_vm1, %v5156_v38  ;;  %v5514_v2 = vpop.f32.mrf.mxu0  ;;  %v5519_v24 = vsel %vm1163_vm3, %v2110_v30, %v2111_v61  ;;  %6416 = vst [vmem:[#allocation15_spill] sm:$0xff] %v5522_v58 }
  0xeb   : > { %v5516_v1 = vpop.f32.mrf.mxu1  ;;  %6415 = vst [vmem:[#allocation14_spill] sm:$0xff] %v5519_v24  ;;  %6419 = vst [vmem:[#allocation18_spill] sm:$0xff] %v5540_v49 }
  0xec   : > { %6414 = vst [vmem:[#allocation13_spill] sm:$0xff] %v5516_v1  ;;  %v5524_v53 = vpop.f32.mrf.mxu0  ;;  %4368 = vmatmul.mubr.msk.f32.gmra.mxu0 %vm382_vm1, %v5305_v59  ;;  %v5561_v59 = vld [vmem:[%s6220_s3] ss:$0 sm:$0xff] }
  0xed   : > { %v5526_v9 = vpop.f32.mrf.mxu1  ;;  %4318 = vmatmul.mubr.msk.f32.gmra.mxu1 %vm382_vm1, %v5170_v34  ;;  %4370 = vmatprep.mubr.msk.f32.mxu0 %vm382_vm1, %v5522_v58 }
  0xee   : > { %6417 = vst [vmem:[#allocation16_spill] sm:$0xff] %v5526_v9  ;;  %4320 = vmatprep.mubr.msk.f32.mxu1 %vm382_vm1, %v5519_v24  ;;  %v5542_v30 = vpop.f32.mrf.mxu0  ;;  %v711_v24 = vadd.f32 %v5435_v14, %v5561_v59 }
  0xef   : > { %v5544_v9 = vpop.f32.mrf.mxu1 }
  0xf0   : > { %6420 = vst [vmem:[#allocation19_spill] sm:$0xff] %v5544_v9  ;;  %v5546_v1 = vpop.f32.mrf.mxu0  ;;  %4371 = vmatmul.mubr.msk.f32.gmra.mxu0 %vm382_vm1, %v5540_v49 }
  0xf1   : > { %v5548_v34 = vpop.f32.mrf.mxu1  ;;  %4321 = vmatmul.mubr.msk.f32.gmra.mxu1 %vm382_vm1, %v5537_v16  ;;  %4425 = vmatprep.mubr.msk.f32.mxu0 %vm382_vm1, %v6381_v5 }
  0xf2   : > { %6421 = vst [vmem:[#allocation20_spill] sm:$0xff] %v5548_v34  ;;  %4375 = vmatprep.mubr.msk.f32.mxu1 %vm382_vm1, %v4800_v62  ;;  %v5563_v61 = vpop.f32.mrf.mxu0  ;;  %v709_v34 = vadd.f32 %v5419_v4, %v5561_v59  ;;  %v708_v62 = vadd.f32 %v5561_v59, %v5431_v10 }
  0xf3   : > { %v5565_v51 = vpop.f32.mrf.mxu1 }
  0xf4   : > { %6422 = vst [vmem:[#allocation21_spill] sm:$0xff] %v5565_v51  ;;  %v4127_v16 = vpop.f32.mrf.mxu0  ;;  %4426 = vmatmul.mubr.msk.f32.vlgmr.msra.gmra.mxu0 %vm382_vm1, %v6382_v18 }
  0xf5   : > { %v4077_v9 = vpop.f32.mrf.mxu1  ;;  %4376 = vmatmul.mubr.msk.f32.vlgmr.msra.gmra.mxu1 %vm382_vm1, %v4849_v43  ;;  %4428 = vmatprep.mubr.msk.f32.mxu0 %vm382_vm1, %v6383_v13 }
  0xf6   : > { %v1132_v5 = vadd.f32 %v4077_v9, %v709_v34  ;;  %4378 = vmatprep.mubr.msk.f32.mxu1 %vm382_vm1, %v4855_v47  ;;  %v1379_v4 = vpop.f32.mrf.mxu0  ;;  %v710_v47 = vadd.f32 %v5561_v59, %v5447_v0 }
  0xf7   : > { %v972_v51 = vpop.f32.mrf.mxu1 }
  0xf8   : > { %v5581_v49 = vadd.f32 %v4127_v16, %v1132_v5  ;;  %v1131_v43 = vadd.f32 %v972_v51, %v708_v62  ;;  %v4130_v18 = vpop.f32.mrf.mxu0  ;;  %4429 = vmatmul.mubr.msk.f32.gmra.mxu0 %vm382_vm1, %v6384_v15 }
  0xf9   : > { %v4080_v58 = vpop.f32.mrf.mxu1  ;;  %4379 = vmatmul.mubr.msk.f32.gmra.mxu1 %vm382_vm1, %v4876_v54  ;;  %4431 = vmatprep.mubr.msk.f32.mxu0 %vm382_vm1, %v6385_v26  ;;  %v713_v54 = vadd.f32 %v5451_v41, %v5561_v59 }
  0xfa   : > { %v5589_v34 = vadd.f32 %v1379_v4, %v1131_v43  ;;  %v1134_v13 = vadd.f32 %v4080_v58, %v711_v24  ;;  %4381 = vmatprep.mubr.msk.f32.mxu1 %vm382_vm1, %v4868_v52  ;;  %v1389_v14 = vpop.f32.mrf.mxu0  ;;  %v712_v52 = vadd.f32 %v5561_v59, %v5463_v22 }
  0xfb   : > { %v982_v10 = vpop.f32.mrf.mxu1 }
  0xfc   : > { %v5597_v9 = vadd.f32 %v4130_v18, %v1134_v13  ;;  %v1133_v15 = vadd.f32 %v982_v10, %v710_v47  ;;  %v4133_v51 = vpop.f32.mrf.mxu0  ;;  %4432 = vmatmul.mubr.msk.f32.gmra.mxu0 %vm382_vm1, %v6386_v17 }
  0xfd   : > { %v4083_v16 = vpop.f32.mrf.mxu1  ;;  %4382 = vmatmul.mubr.msk.f32.gmra.mxu1 %vm382_vm1, %v4899_v36  ;;  %4434 = vmatprep.mubr.msk.f32.mxu0 %vm382_vm1, %v6387_v19  ;;  %v715_v36 = vadd.f32 %v5467_v48, %v5561_v59 }
  0xfe   : > { %v5605_v24 = vadd.f32 %v1389_v14, %v1133_v15  ;;  %v1136_v58 = vadd.f32 %v4083_v16, %v713_v54  ;;  %4384 = vmatprep.mubr.msk.f32.mxu1 %vm382_vm1, %v4905_v46  ;;  %v1399_v26 = vpop.f32.mrf.mxu0  ;;  %v714_v46 = vadd.f32 %v5561_v59, %v5479_v31 }
  0xff   : > { %v992_v41 = vpop.f32.mrf.mxu1 }
 0x100   : > { %v5613_v0 = vadd.f32 %v4133_v51, %v1136_v58  ;;  %v1135_v17 = vadd.f32 %v992_v41, %v712_v52  ;;  %v4136_v5 = vpop.f32.mrf.mxu0  ;;  %4435 = vmatmul.mubr.msk.f32.gmra.mxu0 %vm382_vm1, %v6388_v21 }
 0x101   : > { %v4086_v62 = vpop.f32.mrf.mxu1  ;;  %4385 = vmatmul.mubr.msk.f32.gmra.mxu1 %vm382_vm1, %v4918_v42  ;;  %4437 = vmatprep.mubr.msk.f32.mxu0 %vm382_vm1, %v6389_v23  ;;  %v717_v42 = vadd.f32 %v5483_v60, %v5561_v59 }
 0x102   : > { %v5621_v19 = vadd.f32 %v1399_v26, %v1135_v17  ;;  %v1138_v22 = vadd.f32 %v4086_v62, %v715_v36  ;;  %4387 = vmatprep.mubr.msk.f32.mxu1 %vm382_vm1, %v4921_v50  ;;  %v1409_v4 = vpop.f32.mrf.mxu0  ;;  %v716_v50 = vadd.f32 %v5561_v59, %v5496_v20 }
 0x103   : > { %v1002_v48 = vpop.f32.mrf.mxu1 }
 0x104   : > { %v5629_v43 = vadd.f32 %v4136_v5, %v1138_v22  ;;  %v1137_v21 = vadd.f32 %v1002_v48, %v714_v46  ;;  %v4139_v47 = vpop.f32.mrf.mxu0  ;;  %4438 = vmatmul.mubr.msk.f32.gmra.mxu0 %vm382_vm1, %v6390_v25  ;;  %v6424_v48 = vld [vmem:[#allocation33_spill] sm:$0xff] }
 0x105   : > { %v4089_v18 = vpop.f32.mrf.mxu1  ;;  %4388 = vmatmul.mubr.msk.f32.gmra.mxu1 %vm382_vm1, %v4948_v45  ;;  %4440 = vmatprep.mubr.msk.f32.mxu0 %vm382_vm1, %v6391_v27  ;;  %v719_v45 = vadd.f32 %v5501_v7, %v5561_v59 }
 0x106   : > { %v5637_v23 = vadd.f32 %v1409_v4, %v1137_v21  ;;  %v1140_v31 = vadd.f32 %v4089_v18, %v717_v42  ;;  %4390 = vmatprep.mubr.msk.f32.mxu1 %vm382_vm1, %v4956_v44  ;;  %v1419_v13 = vpop.f32.mrf.mxu0  ;;  %v718_v44 = vadd.f32 %v5561_v59, %v5514_v2  ;;  %v6426_v21 = vld [vmem:[#allocation4_spill] sm:$0xff] }
 0x107   : > { %v1012_v60 = vpop.f32.mrf.mxu1 }
 0x108   : > { %v5645_v10 = vadd.f32 %v4139_v47, %v1140_v31  ;;  %v1139_v25 = vadd.f32 %v1012_v60, %v716_v50  ;;  %v4142_v54 = vpop.f32.mrf.mxu0  ;;  %4441 = vmatmul.mubr.msk.f32.gmra.mxu0 %vm382_vm1, %v6392_v29  ;;  %v6427_v31 = vld [vmem:[#allocation35_spill] sm:$0xff]  ;;  %v6428_v60 = vld [vmem:[#allocation36_spill] sm:$0xff] }
 0x109   : > { %v4092_v14 = vpop.f32.mrf.mxu1  ;;  %4391 = vmatmul.mubr.msk.f32.gmra.mxu1 %vm382_vm1, %v4968_v55  ;;  %4443 = vmatprep.mubr.msk.f32.mxu0 %vm382_vm1, %v6393_v33  ;;  %v721_v55 = vadd.f32 %v5524_v53, %v5561_v59 }
 0x10a   : > { %v5653_v27 = vadd.f32 %v1419_v13, %v1139_v25  ;;  %v1142_v20 = vadd.f32 %v4092_v14, %v719_v45  ;;  %4393 = vmatprep.mubr.msk.f32.mxu1 %vm382_vm1, %v4978_v57  ;;  %v1429_v15 = vpop.f32.mrf.mxu0  ;;  %v720_v57 = vadd.f32 %v5561_v59, %v5542_v30  ;;  %v6429_v13 = vld [vmem:[#allocation5_spill] sm:$0xff] }
 0x10b   : > { %v1022_v7 = vpop.f32.mrf.mxu1  ;;  %v726_v45 = vadd.f32 %v5561_v59, %v6429_v13  ;;  %v6444_v13 = vld [vmem:[#allocation48_spill] sm:$0xff] }
 0x10c   : > { %v5661_v16 = vadd.f32 %v4142_v54, %v1142_v20  ;;  %v1141_v29 = vadd.f32 %v1022_v7, %v718_v44  ;;  %v4145_v52 = vpop.f32.mrf.mxu0  ;;  %4444 = vmatmul.mubr.msk.f32.gmra.mxu0 %vm382_vm1, %v6394_v37  ;;  %v6430_v54 = vld [vmem:[#allocation37_spill] sm:$0xff]  ;;  %v6431_v44 = vld [vmem:[#allocation38_spill] sm:$0xff] }
 0x10d   : > { %v4095_v51 = vpop.f32.mrf.mxu1  ;;  %4394 = vmatmul.mubr.msk.f32.gmra.mxu1 %vm382_vm1, %v4997_v3  ;;  %4446 = vmatprep.mubr.msk.f32.mxu0 %vm382_vm1, %v6395_v40  ;;  %v723_v3 = vadd.f32 %v5546_v1, %v5561_v59 }
 0x10e   : > { %v5669_v33 = vadd.f32 %v1429_v15, %v1141_v29  ;;  %v1144_v2 = vadd.f32 %v4095_v51, %v721_v55  ;;  %4396 = vmatprep.mubr.msk.f32.mxu1 %vm382_vm1, %v5005_v56  ;;  %v1439_v58 = vpop.f32.mrf.mxu0  ;;  %v722_v56 = vadd.f32 %v5561_v59, %v5563_v61  ;;  %v6432_v15 = vld [vmem:[#allocation6_spill] sm:$0xff] }
 0x10f   : > { %v1032_v53 = vpop.f32.mrf.mxu1  ;;  %v729_v55 = vadd.f32 %v6432_v15, %v5561_v59  ;;  %v6447_v15 = vld [vmem:[#allocation15_spill] sm:$0xff] }
 0x110   : > { %v5677_v41 = vadd.f32 %v4145_v52, %v1144_v2  ;;  %v1143_v37 = vadd.f32 %v1032_v53, %v720_v57  ;;  %v4148_v36 = vpop.f32.mrf.mxu0  ;;  %4447 = vmatmul.mubr.msk.f32.gmra.mxu0 %vm382_vm1, %v6396_v32  ;;  %v6433_v2 = vld [vmem:[#allocation39_spill] sm:$0xff] }
 0x111   : > { %v4098_v26 = vpop.f32.mrf.mxu1  ;;  %4397 = vmatmul.mubr.msk.f32.gmra.mxu1 %vm382_vm1, %v5018_v63  ;;  %4449 = vmatprep.mubr.msk.f32.mxu0 %vm382_vm1, %v6397_v8  ;;  %v725_v63 = vadd.f32 %v5421_v6, %v5561_v59  ;;  %v6425_v6 = vld [vmem:[#allocation34_spill] sm:$0xff]  ;;  %v6434_v53 = vld [vmem:[#allocation7_spill] sm:$0xff] }
 0x112   : > { %v5685_v40 = vadd.f32 %v1439_v58, %v1143_v37  ;;  %v1146_v30 = vadd.f32 %v4098_v26, %v723_v3  ;;  %4399 = vmatprep.mubr.msk.f32.mxu1 %vm382_vm1, %v6366_v11  ;;  %v1449_v17 = vpop.f32.mrf.mxu0  ;;  %v6423_v11 = vld [vmem:[#allocation3_spill] sm:$0xff]  ;;  %v728_v58 = vadd.f32 %v5561_v59, %v6434_v53  ;;  %v6435_v26 = vld [vmem:[#allocation41_spill] sm:$0xff] }
 0x113   : > { %v1042_v1 = vpop.f32.mrf.mxu1  ;;  %v724_v61 = vadd.f32 %v5561_v59, %v6423_v11  ;;  %v6439_v11 = vld [vmem:[#allocation9_spill] sm:$0xff] }
 0x114   : > { %v5693_v62 = vadd.f32 %v4148_v36, %v1146_v30  ;;  %v1145_v32 = vadd.f32 %v1042_v1, %v722_v56  ;;  %v4151_v46 = vpop.f32.mrf.mxu0  ;;  %4450 = vmatmul.mubr.msk.f32.gmra.mxu0 %vm382_vm1, %v6400_v28  ;;  %v6436_v30 = vld [vmem:[#allocation8_spill] sm:$0xff] }
 0x115   : > { %v4101_v5 = vpop.f32.mrf.mxu1  ;;  %4400 = vmatmul.mubr.msk.f32.gmra.mxu1 %vm382_vm1, %v5047_v12  ;;  %4452 = vmatprep.mubr.msk.f32.mxu0 %vm382_vm1, %v6425_v6  ;;  %v727_v12 = vadd.f32 %v6426_v21, %v5561_v59  ;;  %v731_v1 = vadd.f32 %v6436_v30, %v5561_v59  ;;  %v6441_v6 = vld [vmem:[#allocation46_spill] sm:$0xff] }
 0x116   : > { %v5701_v8 = vadd.f32 %v1449_v17, %v1145_v32  ;;  %v1148_v22 = vadd.f32 %v4101_v5, %v725_v63  ;;  %4402 = vmatprep.mubr.msk.f32.mxu1 %vm382_vm1, %v6424_v48  ;;  %v1459_v42 = vpop.f32.mrf.mxu0  ;;  %v6437_v5 = vld [vmem:[#allocation43_spill] sm:$0xff]  ;;  %v6440_v48 = vld [vmem:[#allocation45_spill] sm:$0xff]  ;;  %v6442_v21 = vld [vmem:[#allocation10_spill] sm:$0xff] }
 0x117   : > { %v1052_v4 = vpop.f32.mrf.mxu1 }
 0x118   : > { %v5709_v18 = vadd.f32 %v4151_v46, %v1148_v22  ;;  %v1147_v28 = vadd.f32 %v1052_v4, %v724_v61  ;;  %v4154_v50 = vpop.f32.mrf.mxu0  ;;  %4453 = vmatmul.mubr.msk.f32.gmra.mxu0 %vm382_vm1, %v6428_v60  ;;  %v6438_v46 = vld [vmem:[#allocation44_spill] sm:$0xff]  ;;  %v730_v61 = vadd.f32 %v5561_v59, %v6439_v11  ;;  %v6443_v60 = vld [vmem:[#allocation47_spill] sm:$0xff] }
 0x119   : > { %v4104_v47 = vpop.f32.mrf.mxu1  ;;  %4403 = vmatmul.mubr.msk.f32.gmra.mxu1 %vm382_vm1, %v6427_v31  ;;  %4455 = vmatprep.mubr.msk.f32.mxu0 %vm382_vm1, %v6431_v44 }
 0x11a   : > { %v5717_v25 = vadd.f32 %v1459_v42, %v1147_v28  ;;  %v1150_v14 = vadd.f32 %v4104_v47, %v727_v12  ;;  %4405 = vmatprep.mubr.msk.f32.mxu1 %vm382_vm1, %v6430_v54  ;;  %v1469_v7 = vpop.f32.mrf.mxu0  ;;  %v733_v12 = vadd.f32 %v6442_v21, %v5561_v59 }
 0x11b   : > { %v1062_v20 = vpop.f32.mrf.mxu1 }
 0x11c   : > { %v5725_v29 = vadd.f32 %v4154_v50, %v1150_v14  ;;  %v1149_v51 = vadd.f32 %v1062_v20, %v726_v45  ;;  %v4157_v57 = vpop.f32.mrf.mxu0  ;;  %4456 = vmatmul.mubr.msk.f32.gmra.mxu0 %vm382_vm1, %v6408_v35  ;;  %v6445_v45 = vld [vmem:[#allocation11_spill] sm:$0xff]  ;;  %v6446_v20 = vld [vmem:[#allocation49_spill] sm:$0xff] }
 0x11d   : > { %v4107_v52 = vpop.f32.mrf.mxu1  ;;  %4406 = vmatmul.mubr.msk.f32.gmra.mxu1 %vm382_vm1, %v6433_v2  ;;  %4458 = vmatprep.mubr.msk.f32.mxu0 %vm382_vm1, %v6409_v39  ;;  %v732_v14 = vadd.f32 %v5561_v59, %v6445_v45  ;;  %v6456_v45 = vld [vmem:[#allocation30_spill] sm:$0xff] }
 0x11e   : > { %v5733_v3 = vadd.f32 %v1469_v7, %v1149_v51  ;;  %v1152_v37 = vadd.f32 %v4107_v52, %v729_v55  ;;  %4408 = vmatprep.mubr.msk.f32.mxu1 %vm382_vm1, %v6435_v26  ;;  %v1479_v56 = vpop.f32.mrf.mxu0  ;;  %v373_v7 = vld [vmem:[%s5295_s22 + $0x28] sm:$0x3]  ;;  %v2650_v55 = vrot.slane %v6447_v15, 1  ;;  %v2921_v51 = vrot.slane %v6447_v15, 2  ;;  %v6448_v52 = vld [vmem:[#allocation18_spill] sm:$0xff] }
 0x11f   : > { %v1072_v36 = vpop.f32.mrf.mxu1  ;;  %v2922_v2 = vrot.slane %v6448_v52, 2 }
 0x120   : > { %v5741_v17 = vadd.f32 %v4157_v57, %v1152_v37  ;;  %v1151_v35 = vadd.f32 %v1072_v36, %v728_v58  ;;  %v4160_v32 = vpop.f32.mrf.mxu0  ;;  %4459 = vmatmul.mubr.msk.f32.gmra.mxu0 %vm382_vm1, %v6438_v46  ;;  %v2651_v57 = vrot.slane %v6448_v52, 1  ;;  %v6449_v37 = vld [vmem:[#allocation12_spill] sm:$0xff] }
 0x121   : > { %v4110_v63 = vpop.f32.mrf.mxu1  ;;  %4409 = vmatmul.mubr.msk.f32.gmra.mxu1 %vm382_vm1, %v6437_v5  ;;  %4461 = vmatprep.mubr.msk.f32.mxu0 %vm382_vm1, %v6441_v6  ;;  %v735_v26 = vadd.f32 %v6449_v37, %v5561_v59  ;;  %v6452_v5 = vld [vmem:[#allocation13_spill] sm:$0xff]  ;;  %v2923_v21 = vsel %vm1163_vm3, %v2921_v51, %v2922_v2 }
 0x122   : > { %v5749_v39 = vadd.f32 %v1479_v56, %v1151_v35  ;;  %v1154_v22 = vadd.f32 %v4110_v63, %v731_v1  ;;  %4411 = vmatprep.mubr.msk.f32.mxu1 %vm382_vm1, %v6440_v48  ;;  %v1489_v42 = vpop.f32.mrf.mxu0  ;;  %v6451_v35 = vld [vmem:[#allocation51_spill] sm:$0xff]  ;;  %v2653_v63 = vrot.slane %v373_v7, 1  ;;  %v734_v46 = vadd.f32 %v5561_v59, %v6452_v5  ;;  %v6454_v48 = vld [vmem:[#allocation14_spill] sm:$0xff] }
 0x123   : > { %v1082_v4 = vpop.f32.mrf.mxu1 }
 0x124   : > { %v5757_v28 = vadd.f32 %v4160_v32, %v1154_v22  ;;  %v1153_v47 = vadd.f32 %v1082_v4, %v730_v61  ;;  %v4163_v31 = vpop.f32.mrf.mxu0  ;;  %4462 = vmatmul.mubr.msk.f32.gmra.mxu0 %vm382_vm1, %v6444_v13  ;;  %v2924_v32 = vrot.slane %v373_v7, 2  ;;  %v6453_v22 = vld [vmem:[#allocation2_spill] sm:$0xff]  ;;  %v6458_v7 = vld [vmem:[#allocation19_spill] sm:$0xff] }
 0x125   : > { %v4113_v50 = vpop.f32.mrf.mxu1  ;;  %4412 = vmatmul.mubr.msk.f32.gmra.mxu1 %vm382_vm1, %v6443_v60  ;;  %4464 = vmatprep.mubr.msk.f32.mxu0 %vm382_vm1, %v5156_v38  ;;  %v6450_v38 = vld [vmem:[#allocation50_spill] sm:$0xff]  ;;  %v736_v15 = vadd.f32 %v5561_v59, %v6458_v7 }
 0x126   : > { %v5765_v54 = vadd.f32 %v1489_v42, %v1153_v47  ;;  %v1156_v44 = vadd.f32 %v4113_v50, %v733_v12  ;;  %4414 = vmatprep.mubr.msk.f32.mxu1 %vm382_vm1, %v6446_v20  ;;  %v1499_v58 = vpop.f32.mrf.mxu0  ;;  %v2652_v42 = vsel %vm756_vm2, %v2650_v55, %v2651_v57  ;;  %v6455_v12 = vld [vmem:[#allocation16_spill] sm:$0xff]  ;;  %v2925_v20 = vsel %vm1163_vm3, %v2922_v2, %v2924_v32 }
 0x127   : > { %v1092_v53 = vpop.f32.mrf.mxu1  ;;  %v737_v47 = vadd.f32 %v6455_v12, %v5561_v59 }
 0x128   : > { %v5778_v36 = vadd.f32 %v4163_v31, %v1156_v44  ;;  %v1155_v56 = vadd.f32 %v1092_v53, %v732_v14  ;;  %v4166_v1 = vpop.f32.mrf.mxu0  ;;  %4465 = vmatmul.mubr.msk.f32.gmra.mxu0 %vm382_vm1, %v6451_v35  ;;  %v6457_v14 = vld [vmem:[#allocation17_spill] sm:$0xff]  ;;  %v2654_v44 = vsel %vm756_vm2, %v2651_v57, %v2653_v63 }
 0x129   : > { %v4116_v30 = vpop.f32.mrf.mxu1  ;;  %4415 = vmatmul.mubr.msk.f32.gmra.mxu1 %vm382_vm1, %v6450_v38  ;;  %4467 = vmatprep.mubr.msk.f32.mxu0 %vm382_vm1, %v6454_v48 }
 0x12a   : > { %v5786_v11 = vadd.f32 %v1499_v58, %v1155_v56  ;;  %v1158_v61 = vadd.f32 %v4116_v30, %v735_v26  ;;  %4417 = vmatprep.mubr.msk.f32.mxu1 %vm382_vm1, %v6453_v22  ;;  %v1509_v4 = vpop.f32.mrf.mxu0  ;;  %v6459_v58 = vld [vmem:[#allocation20_spill] sm:$0xff]  ;;  %v6460_v30 = vld [vmem:[#allocation21_spill] sm:$0xff] }
 0x12b   : > { %v1102_v6 = vpop.f32.mrf.mxu1  ;;  %v739_v37 = vadd.f32 %v6459_v58, %v5561_v59 }
 0x12c   : > { %v5796_v50 = vadd.f32 %v4166_v1, %v1158_v61  ;;  %v1157_v31 = vadd.f32 %v1102_v6, %v734_v46  ;;  %v4169_v13 = vpop.f32.mrf.mxu0  ;;  %4468 = vmatmul.mubr.msk.f32.gmra.mxu0 %vm382_vm1, %v6457_v14  ;;  %v738_v1 = vadd.f32 %v5561_v59, %v6460_v30 }
 0x12d   : > { %v4119_v60 = vpop.f32.mrf.mxu1  ;;  %4418 = vmatmul.mubr.msk.f32.gmra.mxu1 %vm382_vm1, %v6456_v45  ;;  %4470 = vmatprep.mubr.msk.f32.mxu0 %vm382_vm1, %v2923_v21 }
 0x12e   : > { %v5806_v55 = vadd.f32 %v1509_v4, %v1157_v31  ;;  %v1160_v51 = vadd.f32 %v4119_v60, %v737_v47  ;;  %4420 = vmatprep.mubr.msk.f32.mxu1 %vm382_vm1, %v2652_v42  ;;  %v1519_v53 = vpop.f32.mrf.mxu0 }
 0x12f   : > { %v1112_v52 = vpop.f32.mrf.mxu1 }
 0x130   : > { %v5812_v26 = vadd.f32 %v4169_v13, %v1160_v51  ;;  %v1159_v57 = vadd.f32 %v1112_v52, %v736_v15  ;;  %v4172_v2 = vpop.f32.mrf.mxu0  ;;  %4471 = vmatmul.mubr.msk.f32.gmra.mxu0 %vm382_vm1, %v2925_v20 }
 0x131   : > { %v4122_v56 = vpop.f32.mrf.mxu1  ;;  %4421 = vmatmul.mubr.msk.f32.gmra.mxu1 %vm382_vm1, %v2654_v44 }
 0x132   : > { %v5818_v38 = vadd.f32 %v1519_v53, %v1159_v57  ;;  %v1162_v35 = vadd.f32 %v4122_v56, %v739_v37  ;;  %v1529_v32 = vpop.f32.mrf.mxu0 }
 0x133   : > { %v1122_v63 = vpop.f32.mrf.mxu1 }
 0x134   : > { %v5820_v5 = vadd.f32 %v4172_v2, %v1162_v35  ;;  %v1161_v46 = vadd.f32 %v1122_v63, %v738_v1  ;;  %v4227_v22 = vpop.f32.mrf.mxu0 }
 0x135   : > { %v4177_v61 = vpop.f32.mrf.mxu1 }
 0x136   : > { %v5822_v48 = vadd.f32 %v1529_v32, %v1161_v46  ;;  %v1807_v6 = vadd.f32 %v4177_v61, %v5581_v49  ;;  %v1919_v42 = vpop.f32.mrf.mxu0 }
 0x137   : > { %v1647_v4 = vpop.f32.mrf.mxu1 }
 0x138   : > { %v5825_v21 = vadd.f32 %v4227_v22, %v1807_v6  ;;  %v1806_v59 = vadd.f32 %v1647_v4, %v5589_v34  ;;  %v4230_v47 = vpop.f32.mrf.mxu0 }
 0x139   : > { %v4180_v12 = vpop.f32.mrf.mxu1 }
 0x13a   : > { %v5828_v31 = vadd.f32 %v1919_v42, %v1806_v59  ;;  %v1809_v60 = vadd.f32 %v4180_v12, %v5597_v9  ;;  %v1929_v45 = vpop.f32.mrf.mxu0 }
 0x13b   : > { %v1657_v13 = vpop.f32.mrf.mxu1 }
 0x13c   : > { %v5831_v14 = vadd.f32 %v4230_v47, %v1809_v60  ;;  %v1808_v44 = vadd.f32 %v1657_v13, %v5605_v24  ;;  %v4233_v49 = vpop.f32.mrf.mxu0 }
 0x13d   : > { %v4183_v20 = vpop.f32.mrf.mxu1 }
 0x13e   : > { %v5834_v7 = vadd.f32 %v1929_v45, %v1808_v44  ;;  %v1811_v15 = vadd.f32 %v4183_v20, %v5613_v0  ;;  %v1939_v34 = vpop.f32.mrf.mxu0 }
 0x13f   : > { %v1667_v51 = vpop.f32.mrf.mxu1 }
 0x140   : > { %v5837_v52 = vadd.f32 %v4233_v49, %v1811_v15  ;;  %v1810_v53 = vadd.f32 %v1667_v51, %v5621_v19  ;;  %v4236_v9 = vpop.f32.mrf.mxu0 }
 0x141   : > { %v4186_v58 = vpop.f32.mrf.mxu1 }
 0x142   : > { %v5840_v37 = vadd.f32 %v1939_v34, %v1810_v53  ;;  %v1813_v57 = vadd.f32 %v4186_v58, %v5629_v43  ;;  %v1949_v24 = vpop.f32.mrf.mxu0 }
 0x143   : > { %v1677_v56 = vpop.f32.mrf.mxu1 }
 0x144   : > { %v5843_v2 = vadd.f32 %v4236_v9, %v1813_v57  ;;  %v1812_v30 = vadd.f32 %v1677_v56, %v5637_v23  ;;  %v4239_v0 = vpop.f32.mrf.mxu0 }
 0x145   : > { %v4189_v1 = vpop.f32.mrf.mxu1 }
 0x146   : > { %v5846_v35 = vadd.f32 %v1949_v24, %v1812_v30  ;;  %v1815_v63 = vadd.f32 %v4189_v1, %v5645_v10  ;;  %v1959_v19 = vpop.f32.mrf.mxu0 }
 0x147   : > { %v1687_v32 = vpop.f32.mrf.mxu1 }
 0x148   : > { %v5849_v46 = vadd.f32 %v4239_v0, %v1815_v63  ;;  %v1814_v61 = vadd.f32 %v1687_v32, %v5653_v27  ;;  %v4242_v43 = vpop.f32.mrf.mxu0 }
 0x149   : > { %v4192_v22 = vpop.f32.mrf.mxu1 }
 0x14a   : > { %v5852_v6 = vadd.f32 %v1959_v19, %v1814_v61  ;;  %v1817_v4 = vadd.f32 %v4192_v22, %v5661_v16  ;;  %v1969_v23 = vpop.f32.mrf.mxu0 }
 0x14b   : > { %v1697_v42 = vpop.f32.mrf.mxu1 }
 0x14c   : > { %v5855_v59 = vadd.f32 %v4242_v43, %v1817_v4  ;;  %v1816_v12 = vadd.f32 %v1697_v42, %v5669_v33  ;;  %v4245_v10 = vpop.f32.mrf.mxu0 }
 0x14d   : > { %v4195_v47 = vpop.f32.mrf.mxu1 }
 0x14e   : > { %v5858_v60 = vadd.f32 %v1969_v23, %v1816_v12  ;;  %v1819_v13 = vadd.f32 %v4195_v47, %v5677_v41  ;;  %v1979_v27 = vpop.f32.mrf.mxu0 }
 0x14f   : > { %v1707_v45 = vpop.f32.mrf.mxu1 }
 0x150   : > { %v5861_v44 = vadd.f32 %v4245_v10, %v1819_v13  ;;  %v1818_v20 = vadd.f32 %v1707_v45, %v5685_v40  ;;  %v4248_v16 = vpop.f32.mrf.mxu0 }
 0x151   : > { %v4198_v49 = vpop.f32.mrf.mxu1 }
 0x152   : > { %v5864_v15 = vadd.f32 %v1979_v27, %v1818_v20  ;;  %v1821_v51 = vadd.f32 %v4198_v49, %v5693_v62  ;;  %v1989_v33 = vpop.f32.mrf.mxu0 }
 0x153   : > { %v1717_v34 = vpop.f32.mrf.mxu1 }
 0x154   : > { %v5867_v53 = vadd.f32 %v4248_v16, %v1821_v51  ;;  %v1820_v58 = vadd.f32 %v1717_v34, %v5701_v8  ;;  %v4251_v41 = vpop.f32.mrf.mxu0 }
 0x155   : > { %v4201_v9 = vpop.f32.mrf.mxu1 }
 0x156   : > { %v5870_v57 = vadd.f32 %v1989_v33, %v1820_v58  ;;  %v1823_v56 = vadd.f32 %v4201_v9, %v5709_v18  ;;  %v1999_v40 = vpop.f32.mrf.mxu0 }
 0x157   : > { %v1727_v24 = vpop.f32.mrf.mxu1 }
 0x158   : > { %v5873_v30 = vadd.f32 %v4251_v41, %v1823_v56  ;;  %v1822_v1 = vadd.f32 %v1727_v24, %v5717_v25  ;;  %v4254_v62 = vpop.f32.mrf.mxu0 }
 0x159   : > { %v4204_v0 = vpop.f32.mrf.mxu1 }
 0x15a   : > { %v5876_v63 = vadd.f32 %v1999_v40, %v1822_v1  ;;  %v1825_v32 = vadd.f32 %v4204_v0, %v5725_v29  ;;  %v2009_v8 = vpop.f32.mrf.mxu0 }
 0x15b   : > { %v1737_v19 = vpop.f32.mrf.mxu1 }
 0x15c   : > { %v5879_v61 = vadd.f32 %v4254_v62, %v1825_v32  ;;  %v1824_v22 = vadd.f32 %v1737_v19, %v5733_v3  ;;  %v4257_v18 = vpop.f32.mrf.mxu0 }
 0x15d   : > { %v4207_v43 = vpop.f32.mrf.mxu1 }
 0x15e   : > { %6461 = vst [vmem:[#allocation22_spill] sm:$0xff] %v5879_v61  ;;  %v5882_v4 = vadd.f32 %v2009_v8, %v1824_v22  ;;  %v1827_v42 = vadd.f32 %v4207_v43, %v5741_v17  ;;  %v2019_v25 = vpop.f32.mrf.mxu0 }
 0x15f   : > { %v1747_v23 = vpop.f32.mrf.mxu1 }
 0x160   : > { %6462 = vst [vmem:[#allocation23_spill] sm:$0xff] %v5882_v4  ;;  %v5885_v12 = vadd.f32 %v4257_v18, %v1827_v42  ;;  %v1826_v47 = vadd.f32 %v1747_v23, %v5749_v39  ;;  %v4260_v29 = vpop.f32.mrf.mxu0 }
 0x161   : > { %v4210_v10 = vpop.f32.mrf.mxu1 }
 0x162   : > { %6463 = vst [vmem:[#allocation24_spill] sm:$0xff] %v5885_v12  ;;  %v5888_v13 = vadd.f32 %v2019_v25, %v1826_v47  ;;  %v1829_v45 = vadd.f32 %v4210_v10, %v5757_v28  ;;  %v2029_v3 = vpop.f32.mrf.mxu0 }
 0x163   : > { %v1757_v27 = vpop.f32.mrf.mxu1 }
 0x164   : > { %6464 = vst [vmem:[#allocation25_spill] sm:$0xff] %v5888_v13  ;;  %v5891_v20 = vadd.f32 %v4260_v29, %v1829_v45  ;;  %v1828_v49 = vadd.f32 %v1757_v27, %v5765_v54  ;;  %v4263_v17 = vpop.f32.mrf.mxu0 }
 0x165   : > { %v4213_v16 = vpop.f32.mrf.mxu1 }
 0x166   : > { %6465 = vst [vmem:[#allocation26_spill] sm:$0xff] %v5891_v20  ;;  %v5894_v51 = vadd.f32 %v2029_v3, %v1828_v49  ;;  %v1831_v34 = vadd.f32 %v4213_v16, %v5778_v36  ;;  %v2039_v39 = vpop.f32.mrf.mxu0 }
 0x167   : > { %v1767_v33 = vpop.f32.mrf.mxu1 }
 0x168   : > { %6466 = vst [vmem:[#allocation27_spill] sm:$0xff] %v5894_v51  ;;  %v5897_v58 = vadd.f32 %v4263_v17, %v1831_v34  ;;  %v1830_v9 = vadd.f32 %v1767_v33, %v5786_v11  ;;  %v4266_v28 = vpop.f32.mrf.mxu0 }
 0x169   : > { %v4216_v41 = vpop.f32.mrf.mxu1 }
 0x16a   : > { %6467 = vst [vmem:[#allocation28_spill] sm:$0xff] %v5897_v58  ;;  %v5900_v56 = vadd.f32 %v2039_v39, %v1830_v9  ;;  %v1833_v24 = vadd.f32 %v4216_v41, %v5796_v50  ;;  %v2049_v54 = vpop.f32.mrf.mxu0 }
 0x16b   : > { %v1777_v40 = vpop.f32.mrf.mxu1 }
 0x16c   : > { %6468 = vst [vmem:[#allocation29_spill] sm:$0xff] %v5900_v56  ;;  %v5903_v1 = vadd.f32 %v4266_v28, %v1833_v24  ;;  %v1832_v0 = vadd.f32 %v1777_v40, %v5806_v55  ;;  %v4269_v36 = vpop.f32.mrf.mxu0 }
 0x16d   : > { %v4219_v62 = vpop.f32.mrf.mxu1 }
 0x16e   : > { %6469 = vst [vmem:[#allocation31_spill] sm:$0xff] %v5903_v1  ;;  %v5906_v32 = vadd.f32 %v2049_v54, %v1832_v0  ;;  %v1835_v19 = vadd.f32 %v4219_v62, %v5812_v26  ;;  %v2059_v11 = vpop.f32.mrf.mxu0 }
 0x16f   : > { %v1787_v8 = vpop.f32.mrf.mxu1 }
 0x170   : > { %6470 = vst [vmem:[#allocation32_spill] sm:$0xff] %v5906_v32  ;;  %v5909_v22 = vadd.f32 %v4269_v36, %v1835_v19  ;;  %v1834_v43 = vadd.f32 %v1787_v8, %v5818_v38  ;;  %v4272_v50 = vpop.f32.mrf.mxu0 }
 0x171   : > { %v4222_v18 = vpop.f32.mrf.mxu1 }
 0x172   : > { %6471 = vst [vmem:[#allocation40_spill] sm:$0xff] %v5909_v22  ;;  %v5912_v42 = vadd.f32 %v2059_v11, %v1834_v43  ;;  %v1837_v23 = vadd.f32 %v4222_v18, %v5820_v5  ;;  %v2069_v55 = vpop.f32.mrf.mxu0 }
 0x173   : > { %v1797_v25 = vpop.f32.mrf.mxu1 }
 0x174   : > { %6472 = vst [vmem:[#allocation42_spill] sm:$0xff] %v5912_v42  ;;  %v5915_v47 = vadd.f32 %v4272_v50, %v1837_v23  ;;  %v1836_v10 = vadd.f32 %v1797_v25, %v5822_v48  ;;  %v5918_v26 = vpop.f32.mrf.mxu0 }
 0x175   : > { %v4277_v29 = vpop.f32.mrf.mxu1 }
 0x176   : > { %6473 = vst [vmem:[#allocation3_spill] sm:$0xff] %v5915_v47  ;;  %v5920_v45 = vadd.f32 %v2069_v55, %v1836_v10  ;;  %v5922_v3 = vpop.f32.mrf.mxu0 }
 0x177   : > { %v2190_v27 = vpop.f32.mrf.mxu1 }
 0x178   : > { %6474 = vst [vmem:[#allocation33_spill] sm:$0xff] %v5920_v45  ;;  %v5926_v49 = vpop.f32.mrf.mxu0 }
 0x179   : > { %v5924_v38 = vpop.f32.mrf.mxu1 }
 0x17a   : > { %v5930_v5 = vpop.f32.mrf.mxu0 }
 0x17b   : > { %v5928_v16 = vpop.f32.mrf.mxu1 }
 0x17c   : > { %v5934_v34 = vpop.f32.mrf.mxu0 }
 0x17d   : > { %v5932_v17 = vpop.f32.mrf.mxu1 }
 0x17e   : > { %v5938_v33 = vpop.f32.mrf.mxu0 }
 0x17f   : > { %v5936_v48 = vpop.f32.mrf.mxu1 }
 0x180   : > { %v5942_v9 = vpop.f32.mrf.mxu0 }
 0x181   : > { %v5940_v39 = vpop.f32.mrf.mxu1 }
 0x182   : > { %v5946_v28 = vpop.f32.mrf.mxu0 }
 0x183   : > { %v5944_v41 = vpop.f32.mrf.mxu1 }
 0x184   : > { %v5950_v40 = vpop.f32.mrf.mxu0 }
 0x185   : > { %v5948_v24 = vpop.f32.mrf.mxu1 }
 0x186   : > { %v5954_v0 = vpop.f32.mrf.mxu0 }
 0x187   : > { %v5952_v54 = vpop.f32.mrf.mxu1 }
 0x188   : > { %v5958_v36 = vpop.f32.mrf.mxu0 }
 0x189   : > { %v5956_v62 = vpop.f32.mrf.mxu1 }
 0x18a   : > { %v5962_v8 = vpop.f32.mrf.mxu0 }
 0x18b   : > { %v5960_v19 = vpop.f32.mrf.mxu1 }
 0x18c   : > { %v5966_v43 = vpop.f32.mrf.mxu0 }
 0x18d   : > { %v5964_v11 = vpop.f32.mrf.mxu1 }
 0x18e   : > { %v5970_v50 = vpop.f32.mrf.mxu0 }
 0x18f   : > { %v5968_v18 = vpop.f32.mrf.mxu1 }
 0x190   : > { %v5974_v25 = vpop.f32.mrf.mxu0 }
 0x191   : > { %v5972_v23 = vpop.f32.mrf.mxu1 }
 0x192   : > { %v5978_v10 = vpop.f32.mrf.mxu0 }
 0x193   : > { %v5976_v55 = vpop.f32.mrf.mxu1 }
 0x194   : > { %v5982_v47 = vpop.f32.mrf.mxu0 }
 0x195   : > { %v5980_v45 = vpop.f32.mrf.mxu1 }
 0x196   : > { %v5986_v22 = vpop.f32.mrf.mxu0 }
 0x197   : > { %v5984_v42 = vpop.f32.mrf.mxu1  ;;  %6475 = vst [vmem:[#allocation34_spill] sm:$0xff] %v5986_v22 }
 0x198   : > { %v5990_v1 = vpop.f32.mrf.mxu0 }
 0x199   : > { %v5988_v32 = vpop.f32.mrf.mxu1  ;;  %6477 = vst [vmem:[#allocation35_spill] sm:$0xff] %v5990_v1 }
 0x19a   : > { %6476 = vst [vmem:[#allocation4_spill] sm:$0xff] %v5988_v32  ;;  %v5994_v58 = vpop.f32.mrf.mxu0 }
 0x19b   : > { %v5992_v56 = vpop.f32.mrf.mxu1  ;;  %6479 = vst [vmem:[#allocation5_spill] sm:$0xff] %v5994_v58 }
 0x19c   : > { %6478 = vst [vmem:[#allocation36_spill] sm:$0xff] %v5992_v56  ;;  %v5998_v20 = vpop.f32.mrf.mxu0 }
 0x19d   : > { %v5996_v51 = vpop.f32.mrf.mxu1  ;;  %6481 = vst [vmem:[#allocation38_spill] sm:$0xff] %v5998_v20 }
 0x19e   : > { %6480 = vst [vmem:[#allocation37_spill] sm:$0xff] %v5996_v51  ;;  %v6002_v12 = vpop.f32.mrf.mxu0 }
 0x19f   : > { %v6000_v13 = vpop.f32.mrf.mxu1  ;;  %6483 = vst [vmem:[#allocation39_spill] sm:$0xff] %v6002_v12 }
 0x1a0   : > { %6482 = vst [vmem:[#allocation6_spill] sm:$0xff] %v6000_v13  ;;  %v6006_v61 = vpop.f32.mrf.mxu0 }
 0x1a1   : > { %v6004_v4 = vpop.f32.mrf.mxu1  ;;  %6485 = vst [vmem:[#allocation41_spill] sm:$0xff] %v6006_v61 }
 0x1a2   : > { %6484 = vst [vmem:[#allocation7_spill] sm:$0xff] %v6004_v4  ;;  %v6010_v32 = vpop.f32.mrf.mxu0 }
 0x1a3   : > { %v6008_v22 = vpop.f32.mrf.mxu1  ;;  %6487 = vst [vmem:[#allocation43_spill] sm:$0xff] %v6010_v32 }
 0x1a4   : > { %6486 = vst [vmem:[#allocation8_spill] sm:$0xff] %v6008_v22  ;;  %v6014_v56 = vpop.f32.mrf.mxu0 }
 0x1a5   : > { %v6012_v1 = vpop.f32.mrf.mxu1  ;;  %6489 = vst [vmem:[#allocation9_spill] sm:$0xff] %v6014_v56  ;;  %v2350_v56 = vadd.f32 %v4277_v29, %v5825_v21  ;;  %v2351_v29 = vadd.f32 %v5928_v16, %v5834_v7  ;;  %v2355_v16 = vadd.f32 %v5944_v41, %v5846_v35 }
 0x1a6   : > { %6488 = vst [vmem:[#allocation44_spill] sm:$0xff] %v6012_v1  ;;  %v6018_v51 = vpop.f32.mrf.mxu0 }
 0x1a7   : > { %v6016_v58 = vpop.f32.mrf.mxu1  ;;  %6491 = vst [vmem:[#allocation46_spill] sm:$0xff] %v6018_v51 }
 0x1a8   : > { %6490 = vst [vmem:[#allocation45_spill] sm:$0xff] %v6016_v58  ;;  %v6022_v13 = vpop.f32.mrf.mxu0 }
 0x1a9   : > { %v6020_v20 = vpop.f32.mrf.mxu1  ;;  %6492 = vst [vmem:[#allocation10_spill] sm:$0xff] %v6022_v13  ;;  %v2349_v13 = vadd.f32 %v2190_v27, %v5828_v31  ;;  %v2354_v31 = vadd.f32 %v5932_v17, %v5837_v52  ;;  %v2356_v52 = vadd.f32 %v5940_v39, %v5843_v2 }
 0x1aa   : > { %v6026_v4 = vpop.f32.mrf.mxu0 }
 0x1ab   : > { %v6024_v12 = vpop.f32.mrf.mxu1  ;;  %6494 = vst [vmem:[#allocation48_spill] sm:$0xff] %v6026_v4  ;;  %v2617_v21 = vadd.f32 %v5922_v3, %v2349_v13  ;;  %v2619_v13 = vadd.f32 %v5930_v5, %v2351_v29 }
 0x1ac   : > { %6493 = vst [vmem:[#allocation47_spill] sm:$0xff] %v6024_v12  ;;  %v6030_v22 = vpop.f32.mrf.mxu0 }
 0x1ad   : > { %v6028_v61 = vpop.f32.mrf.mxu1  ;;  %6496 = vst [vmem:[#allocation49_spill] sm:$0xff] %v6030_v22  ;;  %v2352_v22 = vadd.f32 %v5924_v38, %v5831_v14  ;;  %v2353_v14 = vadd.f32 %v5936_v48, %v5840_v37 }
 0x1ae   : > { %6495 = vst [vmem:[#allocation11_spill] sm:$0xff] %v6028_v61  ;;  %v6034_v1 = vpop.f32.mrf.mxu0  ;;  %v2618_v61 = vadd.f32 %v5918_v26, %v2350_v56 }
 0x1af   : > { %v6032_v32 = vpop.f32.mrf.mxu1  ;;  %6498 = vst [vmem:[#allocation18_spill] sm:$0xff] %v6034_v1 }
 0x1b0   : > { %6497 = vst [vmem:[#allocation15_spill] sm:$0xff] %v6032_v32  ;;  %v6039_v51 = vpop.f32.mrf.mxu0 }
 0x1b1   : > { %v6037_v58 = vpop.f32.mrf.mxu1  ;;  %6500 = vst [vmem:[#allocation50_spill] sm:$0xff] %v6039_v51 }
 0x1b2   : > { %6499 = vst [vmem:[#allocation12_spill] sm:$0xff] %v6037_v58  ;;  %v6044_v4 = vpop.f32.mrf.mxu0 }
 0x1b3   : > { %v6042_v12 = vpop.f32.mrf.mxu1  ;;  %6502 = vst [vmem:[#allocation13_spill] sm:$0xff] %v6044_v4  ;;  %v2620_v4 = vadd.f32 %v5926_v49, %v2352_v22 }
 0x1b4   : > { %6501 = vst [vmem:[#allocation51_spill] sm:$0xff] %v6042_v12  ;;  %v4427_v1 = vpop.f32.mrf.mxu0 }
 0x1b5   : > { %v4377_v32 = vpop.f32.mrf.mxu1 }
 0x1b6   : > { %v2890_v58 = vadd.f32 %v4377_v32, %v2618_v61  ;;  %v3001_v51 = vpop.f32.mrf.mxu0  ;;  %v2622_v32 = vadd.f32 %v5934_v34, %v2354_v31 }
 0x1b7   : > { %v2730_v27 = vpop.f32.mrf.mxu1 }
 0x1b8   : > { %v3161_v56 = vadd.f32 %v4427_v1, %v2890_v58  ;;  %v2889_v26 = vadd.f32 %v2730_v27, %v2617_v21  ;;  %v4430_v12 = vpop.f32.mrf.mxu0  ;;  %v2624_v21 = vadd.f32 %v5942_v9, %v2356_v52 }
 0x1b9   : > { %v4380_v38 = vpop.f32.mrf.mxu1 }
 0x1ba   : > { %v3193_v3 = vmul.f32 0.2, %v3161_v56  ;;  %v3160_v7 = vadd.f32 %v3001_v51, %v2889_v26  ;;  %v2892_v61 = vadd.f32 %v4380_v38, %v2620_v4  ;;  %v3011_v58 = vpop.f32.mrf.mxu0  ;;  %v2621_v4 = vadd.f32 %v5938_v33, %v2353_v14 }
 0x1bb   : > { %v2740_v37 = vpop.f32.mrf.mxu1  ;;  %v2357_v26 = vadd.f32 %v5952_v54, %v5852_v6 }
 0x1bc   : > { %v3225_v1 = vmax.f32 %v3161_v56, %v3193_v3  ;;  %v3192_v22 = vmul.f32 0.2, %v3160_v7  ;;  %v3163_v49 = vadd.f32 %v4430_v12, %v2892_v61  ;;  %v2891_v51 = vadd.f32 %v2740_v37, %v2619_v13  ;;  %v4433_v5 = vpop.f32.mrf.mxu0 }
 0x1bd   : > { %v4383_v2 = vpop.f32.mrf.mxu1  ;;  %v2358_v12 = vadd.f32 %v5948_v24, %v5849_v46  ;;  %v2623_v56 = vadd.f32 %v5946_v28, %v2355_v16  ;;  %v2625_v37 = vadd.f32 %v5954_v0, %v2357_v26 }
 0x1be   : > { %3258 = vst.msk [vmem:[%s6065_s15 + $0x8] sm:$0xff] %vm3256_vm4, %v3225_v1  ;;  %v3224_v17 = vmax.f32 %v3160_v7, %v3192_v22  ;;  %v3195_v34 = vmul.f32 0.2, %v3163_v49  ;;  %v3162_v48 = vadd.f32 %v3011_v58, %v2891_v51  ;;  %v2894_v39 = vadd.f32 %v4383_v2, %v2622_v32  ;;  %v3021_v31 = vpop.f32.mrf.mxu0 }
 0x1bf   : > { %v2750_v29 = vpop.f32.mrf.mxu1  ;;  %v2626_v3 = vadd.f32 %v5950_v40, %v2358_v12  ;;  %v2360_v7 = vadd.f32 %v5956_v62, %v5855_v59  ;;  %v2359_v58 = vadd.f32 %v5960_v19, %v5858_v60 }
 0x1c0   : > { %3257 = vst.msk [vmem:[%s6065_s15] sm:$0xff] %vm3256_vm4, %v3224_v17  ;;  %v3227_v33 = vmax.f32 %v3163_v49, %v3195_v34  ;;  %v3194_v35 = vmul.f32 0.2, %v3162_v48  ;;  %v3165_v41 = vadd.f32 %v4433_v5, %v2894_v39  ;;  %v2893_v27 = vadd.f32 %v2750_v29, %v2621_v4  ;;  %v4436_v38 = vpop.f32.mrf.mxu0 }
 0x1c1   : > { %v4386_v14 = vpop.f32.mrf.mxu1  ;;  %v2628_v51 = vadd.f32 %v5958_v36, %v2360_v7  ;;  %v2362_v4 = vadd.f32 %v5964_v11, %v5861_v44  ;;  %v2627_v17 = vadd.f32 %v5962_v8, %v2359_v58  ;;  %v2361_v34 = vadd.f32 %v5968_v18, %v5864_v15 }
 0x1c2   : > { %3260 = vst.msk [vmem:[%s6065_s15 + $0x18] sm:$0xff] %vm3256_vm4, %v3227_v33  ;;  %v3226_v9 = vmax.f32 %v3162_v48, %v3194_v35  ;;  %v3197_v46 = vmul.f32 0.2, %v3165_v41  ;;  %v3164_v24 = vadd.f32 %v3021_v31, %v2893_v27  ;;  %v2896_v13 = vadd.f32 %v4386_v14, %v2624_v21  ;;  %v3031_v32 = vpop.f32.mrf.mxu0 }
 0x1c3   : > { %v2760_v61 = vpop.f32.mrf.mxu1  ;;  %v2630_v12 = vadd.f32 %v5966_v43, %v2362_v4  ;;  %v2364_v29 = vadd.f32 %v5972_v23, %v5867_v53  ;;  %v2363_v27 = vadd.f32 %v5976_v55, %v5870_v57  ;;  %v2365_v7 = vadd.f32 %v5984_v42, %v5876_v63 }
 0x1c4   : > { %3259 = vst.msk [vmem:[%s6065_s15 + $0x10] sm:$0xff] %vm3256_vm4, %v3226_v9  ;;  %v3229_v28 = vmax.f32 %v3165_v41, %v3197_v46  ;;  %v3196_v6 = vmul.f32 0.2, %v3164_v24  ;;  %v3167_v54 = vadd.f32 %v4436_v38, %v2896_v13  ;;  %v2895_v52 = vadd.f32 %v2760_v61, %v2623_v56  ;;  %v4439_v22 = vpop.f32.mrf.mxu0 }
 0x1c5   : > { %v4389_v1 = vpop.f32.mrf.mxu1  ;;  %v2629_v41 = vadd.f32 %v5970_v50, %v2361_v34  ;;  %v2632_v38 = vadd.f32 %v5974_v25, %v2364_v29  ;;  %v2366_v9 = vadd.f32 %v5980_v45, %v5873_v30  ;;  %v6510_v34 = vld [vmem:[#allocation37_spill] sm:$0xff] }
 0x1c6   : > { %3262 = vst.msk [vmem:[%s6065_s15 + $0x28] sm:$0xff] %vm3256_vm4, %v3229_v28  ;;  %v3228_v40 = vmax.f32 %v3164_v24, %v3196_v6  ;;  %v3199_v59 = vmul.f32 0.2, %v3167_v54  ;;  %v3166_v62 = vadd.f32 %v3031_v32, %v2895_v52  ;;  %v2898_v49 = vadd.f32 %v4389_v1, %v2626_v3  ;;  %v3041_v2 = vpop.f32.mrf.mxu0  ;;  %v6504_v52 = vld [vmem:[#allocation4_spill] sm:$0xff]  ;;  %v6511_v29 = vld [vmem:[#allocation5_spill] sm:$0xff] }
 0x1c7   : > { %v2770_v16 = vpop.f32.mrf.mxu1  ;;  %v2631_v3 = vadd.f32 %v5978_v10, %v2363_v27  ;;  %v2634_v6 = vadd.f32 %v5982_v47, %v2366_v9 }
 0x1c8   : > { %3261 = vst.msk [vmem:[%s6065_s15 + $0x20] sm:$0xff] %vm3256_vm4, %v3228_v40  ;;  %v3231_v0 = vmax.f32 %v3167_v54, %v3199_v59  ;;  %v3198_v60 = vmul.f32 0.2, %v3166_v62  ;;  %v3169_v19 = vadd.f32 %v4439_v22, %v2898_v49  ;;  %v2897_v5 = vadd.f32 %v2770_v16, %v2625_v37  ;;  %v4442_v39 = vpop.f32.mrf.mxu0  ;;  %v6503_v54 = vld [vmem:[#allocation22_spill] sm:$0xff]  ;;  %v6507_v49 = vld [vmem:[#allocation36_spill] sm:$0xff] }
 0x1c9   : > { %v4392_v48 = vpop.f32.mrf.mxu1  ;;  %v2368_v37 = vadd.f32 %v6504_v52, %v6503_v54  ;;  %v6505_v40 = vld [vmem:[#allocation34_spill] sm:$0xff]  ;;  %v6520_v52 = vld [vmem:[#allocation41_spill] sm:$0xff] }
 0x1ca   : > { %3264 = vst.msk [vmem:[%s6065_s15 + $0x38] sm:$0xff] %vm3256_vm4, %v3231_v0  ;;  %v3230_v36 = vmax.f32 %v3166_v62, %v3198_v60  ;;  %v3201_v44 = vmul.f32 0.2, %v3169_v19  ;;  %v3168_v11 = vadd.f32 %v3041_v2, %v2897_v5  ;;  %v2900_v21 = vadd.f32 %v4392_v48, %v2628_v51  ;;  %v3051_v33 = vpop.f32.mrf.mxu0  ;;  %v6506_v62 = vld [vmem:[#allocation23_spill] sm:$0xff] }
 0x1cb   : > { %v2780_v31 = vpop.f32.mrf.mxu1  ;;  %v2633_v59 = vadd.f32 %v6505_v40, %v2365_v7  ;;  %v2367_v51 = vadd.f32 %v6507_v49, %v6506_v62  ;;  %v6518_v7 = vld [vmem:[#allocation27_spill] sm:$0xff] }
 0x1cc   : > { %3263 = vst.msk [vmem:[%s6065_s15 + $0x30] sm:$0xff] %vm3256_vm4, %v3230_v36  ;;  %v3233_v8 = vmax.f32 %v3169_v19, %v3201_v44  ;;  %v3200_v15 = vmul.f32 0.2, %v3168_v11  ;;  %v3171_v18 = vadd.f32 %v4442_v39, %v2900_v21  ;;  %v2899_v35 = vadd.f32 %v2780_v31, %v2627_v17  ;;  %v4445_v26 = vpop.f32.mrf.mxu0  ;;  %v6508_v19 = vld [vmem:[#allocation35_spill] sm:$0xff]  ;;  %v6509_v17 = vld [vmem:[#allocation24_spill] sm:$0xff] }
 0x1cd   : > { %v4395_v56 = vpop.f32.mrf.mxu1  ;;  %v2636_v5 = vadd.f32 %v6508_v19, %v2368_v37  ;;  %v2370_v48 = vadd.f32 %v6510_v34, %v6509_v17  ;;  %v2635_v31 = vadd.f32 %v6511_v29, %v2367_v51  ;;  %v6523_v49 = vld [vmem:[#allocation43_spill] sm:$0xff]  ;;  %v6526_v34 = vld [vmem:[#allocation9_spill] sm:$0xff] }
 0x1ce   : > { %3266 = vst.msk [vmem:[%s6065_s15 + $0x48] sm:$0xff] %vm3256_vm4, %v3233_v8  ;;  %v3232_v43 = vmax.f32 %v3168_v11, %v3200_v15  ;;  %v3203_v53 = vmul.f32 0.2, %v3171_v18  ;;  %v3170_v23 = vadd.f32 %v3051_v33, %v2899_v35  ;;  %v2902_v14 = vadd.f32 %v4395_v56, %v2630_v12  ;;  %v3061_v24 = vpop.f32.mrf.mxu0  ;;  %v6512_v33 = vld [vmem:[#allocation25_spill] sm:$0xff]  ;;  %v6513_v8 = vld [vmem:[#allocation6_spill] sm:$0xff] }
 0x1cf   : > { %v2790_v46 = vpop.f32.mrf.mxu1  ;;  %v2369_v15 = vadd.f32 %v6513_v8, %v6512_v33  ;;  %v6528_v33 = vld [vmem:[#allocation46_spill] sm:$0xff] }
 0x1d0   : > { %3265 = vst.msk [vmem:[%s6065_s15 + $0x40] sm:$0xff] %vm3256_vm4, %v3232_v43  ;;  %v3235_v50 = vmax.f32 %v3171_v18, %v3203_v53  ;;  %v3202_v57 = vmul.f32 0.2, %v3170_v23  ;;  %v3173_v55 = vadd.f32 %v4445_v26, %v2902_v14  ;;  %v2901_v13 = vadd.f32 %v2790_v46, %v2629_v41  ;;  %v4448_v32 = vpop.f32.mrf.mxu0  ;;  %v6514_v43 = vld [vmem:[#allocation38_spill] sm:$0xff]  ;;  %v6516_v14 = vld [vmem:[#allocation7_spill] sm:$0xff] }
 0x1d1   : > { %v4398_v61 = vpop.f32.mrf.mxu1  ;;  %v2638_v53 = vadd.f32 %v6514_v43, %v2370_v48 }
 0x1d2   : > { %3268 = vst.msk [vmem:[%s6065_s15 + $0x58] sm:$0xff] %vm3256_vm4, %v3235_v50  ;;  %v3234_v25 = vmax.f32 %v3170_v23, %v3202_v57  ;;  %v3205_v30 = vmul.f32 0.2, %v3173_v55  ;;  %v3172_v45 = vadd.f32 %v3061_v24, %v2901_v13  ;;  %v2904_v28 = vadd.f32 %v4398_v61, %v2632_v38  ;;  %v3071_v1 = vpop.f32.mrf.mxu0  ;;  %v6515_v23 = vld [vmem:[#allocation26_spill] sm:$0xff]  ;;  %v6517_v13 = vld [vmem:[#allocation39_spill] sm:$0xff]  ;;  %v6519_v61 = vld [vmem:[#allocation8_spill] sm:$0xff] }
 0x1d3   : > { %v2800_v58 = vpop.f32.mrf.mxu1  ;;  %v2372_v38 = vadd.f32 %v6516_v14, %v6515_v23  ;;  %v6532_v14 = vld [vmem:[#allocation40_spill] sm:$0xff] }
 0x1d4   : > { %3267 = vst.msk [vmem:[%s6065_s15 + $0x50] sm:$0xff] %vm3256_vm4, %v3234_v25  ;;  %v3237_v10 = vmax.f32 %v3173_v55, %v3205_v30  ;;  %v3204_v63 = vmul.f32 0.2, %v3172_v45  ;;  %v3175_v42 = vadd.f32 %v4448_v32, %v2904_v28  ;;  %v2903_v22 = vadd.f32 %v2800_v58, %v2631_v3  ;;  %v4451_v16 = vpop.f32.mrf.mxu0  ;;  %v6521_v58 = vld [vmem:[#allocation28_spill] sm:$0xff] }
 0x1d5   : > { %v4401_v4 = vpop.f32.mrf.mxu1  ;;  %v2637_v3 = vadd.f32 %v6517_v13, %v2369_v15  ;;  %v2371_v32 = vadd.f32 %v6519_v61, %v6518_v7  ;;  %v2640_v37 = vadd.f32 %v6520_v52, %v2372_v38  ;;  %v6529_v15 = vld [vmem:[#allocation32_spill] sm:$0xff]  ;;  %v6533_v38 = vld [vmem:[#allocation11_spill] sm:$0xff]  ;;  %v6535_v61 = vld [vmem:[#allocation42_spill] sm:$0xff] }
 0x1d6   : > { %3270 = vst.msk [vmem:[%s6065_s15 + $0x68] sm:$0xff] %vm3256_vm4, %v3237_v10  ;;  %v3236_v47 = vmax.f32 %v3172_v45, %v3204_v63  ;;  %v3207_v2 = vmul.f32 0.2, %v3175_v42  ;;  %v3174_v0 = vadd.f32 %v3071_v1, %v2903_v22  ;;  %v2906_v60 = vadd.f32 %v4401_v4, %v2634_v6  ;;  %v3081_v36 = vpop.f32.mrf.mxu0  ;;  %v6522_v1 = vld [vmem:[#allocation44_spill] sm:$0xff]  ;;  %v6524_v4 = vld [vmem:[#allocation29_spill] sm:$0xff] }
 0x1d7   : > { %v2810_v39 = vpop.f32.mrf.mxu1  ;;  %v2374_v10 = vadd.f32 %v6522_v1, %v6521_v58  ;;  %v2639_v51 = vadd.f32 %v6523_v49, %v2371_v32  ;;  %v6536_v32 = vld [vmem:[#allocation15_spill] sm:$0xff] }
 0x1d8   : > { %3269 = vst.msk [vmem:[%s6065_s15 + $0x60] sm:$0xff] %vm3256_vm4, %v3236_v47  ;;  %v3239_v44 = vmax.f32 %v3175_v42, %v3207_v2  ;;  %v3206_v11 = vmul.f32 0.2, %v3174_v0  ;;  %v3177_v21 = vadd.f32 %v4451_v16, %v2906_v60  ;;  %v2905_v12 = vadd.f32 %v2810_v39, %v2633_v59  ;;  %v4454_v35 = vpop.f32.mrf.mxu0  ;;  %v6525_v16 = vld [vmem:[#allocation45_spill] sm:$0xff]  ;;  %v6527_v39 = vld [vmem:[#allocation31_spill] sm:$0xff] }
 0x1d9   : > { %v4404_v18 = vpop.f32.mrf.mxu1  ;;  %v2373_v47 = vadd.f32 %v6525_v16, %v6524_v4  ;;  %v2642_v48 = vadd.f32 %v6526_v34, %v2374_v10  ;;  %v6538_v1 = vld [vmem:[#allocation3_spill] sm:$0xff]  ;;  %v6539_v10 = vld [vmem:[#allocation12_spill] sm:$0xff]  ;;  %v6541_v16 = vld [vmem:[#allocation33_spill] sm:$0xff] }
 0x1da   : > { %3272 = vst.msk [vmem:[%s6065_s15 + $0x78] sm:$0xff] %vm3256_vm4, %v3239_v44  ;;  %v3238_v41 = vmax.f32 %v3174_v0, %v3206_v11  ;;  %v3209_v27 = vmul.f32 0.2, %v3177_v21  ;;  %v3176_v56 = vadd.f32 %v3081_v36, %v2905_v12  ;;  %v2908_v26 = vadd.f32 %v4404_v18, %v2636_v5  ;;  %v3091_v46 = vpop.f32.mrf.mxu0  ;;  %v6530_v18 = vld [vmem:[#allocation47_spill] sm:$0xff] }
 0x1db   : > { %v2820_v9 = vpop.f32.mrf.mxu1  ;;  %v2376_v36 = vadd.f32 %v6020_v20, %v6527_v39  ;;  %v2641_v8 = vadd.f32 %v6528_v33, %v2373_v47  ;;  %v6542_v47 = vld [vmem:[#allocation51_spill] sm:$0xff] }
 0x1dc   : > { %3271 = vst.msk [vmem:[%s6065_s15 + $0x70] sm:$0xff] %vm3256_vm4, %v3238_v41  ;;  %v3241_v24 = vmax.f32 %v3177_v21, %v3209_v27  ;;  %v3208_v50 = vmul.f32 0.2, %v3176_v56  ;;  %v3179_v57 = vadd.f32 %v4454_v35, %v2908_v26  ;;  %v2907_v55 = vadd.f32 %v2820_v9, %v2635_v31  ;;  %v4457_v30 = vpop.f32.mrf.mxu0 }
 0x1dd   : > { %v4407_v25 = vpop.f32.mrf.mxu1  ;;  %v2375_v35 = vadd.f32 %v6530_v18, %v6529_v15  ;;  %v2378_v9 = vadd.f32 %v6533_v38, %v6532_v14 }
 0x1de   : > { %3274 = vst.msk [vmem:[%s6065_s15 + $0x88] sm:$0xff] %vm3256_vm4, %v3241_v24  ;;  %v3240_v45 = vmax.f32 %v3176_v56, %v3208_v50  ;;  %v3211_v28 = vmul.f32 0.2, %v3179_v57  ;;  %v3178_v6 = vadd.f32 %v3091_v46, %v2907_v55  ;;  %v2910_v54 = vadd.f32 %v4407_v25, %v2638_v53  ;;  %v3101_v42 = vpop.f32.mrf.mxu0  ;;  %v6531_v53 = vld [vmem:[#allocation10_spill] sm:$0xff] }
 0x1df   : > { %v2830_v63 = vpop.f32.mrf.mxu1  ;;  %v2644_v23 = vadd.f32 %v6531_v53, %v2376_v36  ;;  %v2377_v25 = vadd.f32 %v6536_v32, %v6535_v61 }
 0x1e0   : > { %3273 = vst.msk [vmem:[%s6065_s15 + $0x80] sm:$0xff] %vm3256_vm4, %v3240_v45  ;;  %v3243_v22 = vmax.f32 %v3179_v57, %v3211_v28  ;;  %v3210_v40 = vmul.f32 0.2, %v3178_v6  ;;  %v3181_v59 = vadd.f32 %v4457_v30, %v2910_v54  ;;  %v2909_v62 = vadd.f32 %v2830_v63, %v2637_v3  ;;  %v4460_v0 = vpop.f32.mrf.mxu0  ;;  %v6534_v3 = vld [vmem:[#allocation48_spill] sm:$0xff] }
 0x1e1   : > { %v4410_v2 = vpop.f32.mrf.mxu1  ;;  %v2643_v7 = vadd.f32 %v6534_v3, %v2375_v35  ;;  %v2380_v63 = vadd.f32 %v6539_v10, %v6538_v1 }
 0x1e2   : > { %3276 = vst.msk [vmem:[%s6065_s15 + $0x98] sm:$0xff] %vm3256_vm4, %v3243_v22  ;;  %v3242_v60 = vmax.f32 %v3178_v6, %v3210_v40  ;;  %v3213_v19 = vmul.f32 0.2, %v3181_v59  ;;  %v3180_v5 = vadd.f32 %v3101_v42, %v2909_v62  ;;  %v2912_v17 = vadd.f32 %v4410_v2, %v2640_v37  ;;  %v3111_v11 = vpop.f32.mrf.mxu0  ;;  %v6537_v37 = vld [vmem:[#allocation49_spill] sm:$0xff] }
 0x1e3   : > { %v2840_v44 = vpop.f32.mrf.mxu1  ;;  %v2646_v58 = vadd.f32 %v6537_v37, %v2378_v9  ;;  %v2379_v2 = vadd.f32 %v6542_v47, %v6541_v16 }
 0x1e4   : > { %3275 = vst.msk [vmem:[%s6065_s15 + $0x90] sm:$0xff] %vm3256_vm4, %v3242_v60  ;;  %v3245_v21 = vmax.f32 %v3181_v59, %v3213_v19  ;;  %v3212_v12 = vmul.f32 0.2, %v3180_v5  ;;  %v3183_v29 = vadd.f32 %v4460_v0, %v2912_v17  ;;  %v2911_v31 = vadd.f32 %v2840_v44, %v2639_v51  ;;  %v4463_v27 = vpop.f32.mrf.mxu0  ;;  %v6540_v51 = vld [vmem:[#allocation18_spill] sm:$0xff] }
 0x1e5   : > { %v4413_v41 = vpop.f32.mrf.mxu1  ;;  %v2645_v4 = vadd.f32 %v6540_v51, %v2377_v25 }
 0x1e6   : > { %3278 = vst.msk [vmem:[%s6065_s15 + $0xa8] sm:$0xff] %vm3256_vm4, %v3245_v21  ;;  %v3244_v56 = vmax.f32 %v3180_v5, %v3212_v12  ;;  %v3215_v20 = vmul.f32 0.2, %v3183_v29  ;;  %v3182_v26 = vadd.f32 %v3111_v11, %v2911_v31  ;;  %v2914_v43 = vadd.f32 %v4413_v41, %v2642_v48  ;;  %v3121_v24 = vpop.f32.mrf.mxu0  ;;  %v6543_v48 = vld [vmem:[#allocation50_spill] sm:$0xff]  ;;  %v6544_v31 = vld [vmem:[#allocation13_spill] sm:$0xff] }
 0x1e7   : > { %v2850_v46 = vpop.f32.mrf.mxu1  ;;  %v2648_v39 = vadd.f32 %v6543_v48, %v2380_v63  ;;  %v2647_v33 = vadd.f32 %v6544_v31, %v2379_v2 }
 0x1e8   : > { %3277 = vst.msk [vmem:[%s6065_s15 + $0xa0] sm:$0xff] %vm3256_vm4, %v3244_v56  ;;  %v3247_v50 = vmax.f32 %v3183_v29, %v3215_v20  ;;  %v3214_v57 = vmul.f32 0.2, %v3182_v26  ;;  %v3185_v55 = vadd.f32 %v4463_v27, %v2914_v43  ;;  %v2913_v13 = vadd.f32 %v2850_v46, %v2641_v8  ;;  %v4466_v45 = vpop.f32.mrf.mxu0 }
 0x1e9   : > { %v4416_v30 = vpop.f32.mrf.mxu1 }
 0x1ea   : > { %3280 = vst.msk [vmem:[%s6065_s15 + $0xb8] sm:$0xff] %vm3256_vm4, %v3247_v50  ;;  %v3246_v28 = vmax.f32 %v3182_v26, %v3214_v57  ;;  %v3217_v6 = vmul.f32 0.2, %v3185_v55  ;;  %v3184_v54 = vadd.f32 %v3121_v24, %v2913_v13  ;;  %v2916_v52 = vadd.f32 %v4416_v30, %v2644_v23  ;;  %v3131_v22 = vpop.f32.mrf.mxu0 }
 0x1eb   : > { %v2860_v42 = vpop.f32.mrf.mxu1 }
 0x1ec   : > { %3279 = vst.msk [vmem:[%s6065_s15 + $0xb0] sm:$0xff] %vm3256_vm4, %v3246_v28  ;;  %v3249_v40 = vmax.f32 %v3185_v55, %v3217_v6  ;;  %v3216_v59 = vmul.f32 0.2, %v3184_v54  ;;  %v3187_v62 = vadd.f32 %v4466_v45, %v2916_v52  ;;  %v2915_v49 = vadd.f32 %v2860_v42, %v2643_v7  ;;  %v4469_v60 = vpop.f32.mrf.mxu0 }
 0x1ed   : > { %v4419_v0 = vpop.f32.mrf.mxu1 }
 0x1ee   : > { %3282 = vst.msk [vmem:[%s6065_s15 + $0xc8] sm:$0xff] %vm3256_vm4, %v3249_v40  ;;  %v3248_v19 = vmax.f32 %v3184_v54, %v3216_v59  ;;  %v3219_v5 = vmul.f32 0.2, %v3187_v62  ;;  %v3186_v17 = vadd.f32 %v3131_v22, %v2915_v49  ;;  %v2918_v34 = vadd.f32 %v4419_v0, %v2646_v58  ;;  %v3141_v44 = vpop.f32.mrf.mxu0 }
 0x1ef   : > { %v2870_v36 = vpop.f32.mrf.mxu1 }
 0x1f0   : > { %3281 = vst.msk [vmem:[%s6065_s15 + $0xc0] sm:$0xff] %vm3256_vm4, %v3248_v19  ;;  %v3251_v11 = vmax.f32 %v3187_v62, %v3219_v5  ;;  %v3218_v21 = vmul.f32 0.2, %v3186_v17  ;;  %v3189_v12 = vadd.f32 %v4469_v60, %v2918_v34  ;;  %v2917_v29 = vadd.f32 %v2870_v36, %v2645_v4  ;;  %v4472_v15 = vpop.f32.mrf.mxu0 }
 0x1f1   : > { %v4422_v8 = vpop.f32.mrf.mxu1 }
 0x1f2   : > { %3284 = vst.msk [vmem:[%s6065_s15 + $0xd8] sm:$0xff] %vm3256_vm4, %v3251_v11  ;;  %v3250_v18 = vmax.f32 %v3186_v17, %v3218_v21  ;;  %v3221_v35 = vmul.f32 0.2, %v3189_v12  ;;  %v3188_v41 = vadd.f32 %v3141_v44, %v2917_v29  ;;  %v2920_v27 = vadd.f32 %v4422_v8, %v2648_v39  ;;  %v3151_v23 = vpop.f32.mrf.mxu0 }
 0x1f3   : > { %v2880_v56 = vpop.f32.mrf.mxu1 }
 0x1f4   : > { %3283 = vst.msk [vmem:[%s6065_s15 + $0xd0] sm:$0xff] %vm3256_vm4, %v3250_v18  ;;  %v3253_v20 = vmax.f32 %v3189_v12, %v3221_v35  ;;  %v3220_v26 = vmul.f32 0.2, %v3188_v41  ;;  %v3191_v43 = vadd.f32 %v4472_v15, %v2920_v27  ;;  %v2919_v53 = vadd.f32 %v2880_v56, %v2647_v33 }
 0x1f6   : > { %3286 = vst.msk [vmem:[%s6065_s15 + $0xe8] sm:$0xff] %vm3256_vm4, %v3253_v20  ;;  %v3252_v14 = vmax.f32 %v3188_v41, %v3220_v26  ;;  %v3223_v38 = vmul.f32 0.2, %v3191_v43  ;;  %v3190_v9 = vadd.f32 %v3151_v23, %v2919_v53 }
 0x1f8   : > { %3285 = vst.msk [vmem:[%s6065_s15 + $0xe0] sm:$0xff] %vm3256_vm4, %v3252_v14  ;;  %v3255_v46 = vmax.f32 %v3191_v43, %v3223_v38  ;;  %v3222_v24 = vmul.f32 0.2, %v3190_v9 }
 0x1fa   : > { %3288 = vst.msk [vmem:[%s6065_s15 + $0xf8] sm:$0xff] %vm3256_vm4, %v3255_v46  ;;  %v3254_v50 = vmax.f32 %v3190_v9, %v3222_v24 }
 0x1fc   : > { %3287 = vst.msk [vmem:[%s6065_s15 + $0xf0] sm:$0xff] %vm3256_vm4, %v3254_v50 }
 0x1fd PF: > { %s14_s17 = sadd.s32 1, %s4524_s17   ;;  %s6545_s15 = smov %s4520_s16 }
 0x1fe   : > { %p11_p5 = scmp.ge.s32.totalorder %s14_s17, 4   ;;  %s6546_s16 = smov %s6548_s18 }
 0x200   :  { %13 = sbr.rel (!%p11_p5) target bundleno = 2 (0x2), region = 77 }

</bundles_post_ra>
